<compile_context>
chip_gen: v7x
topology: tpu7x:2x2x1
jax: 0.10.0
libtpu: 0.0.40
codegen_flags: <defaults>
</compile_context>

<pallas_src>
import functools

import jax
import jax.numpy as jnp
from jax import lax
from jax.experimental import pallas as pl
from jax.experimental.pallas import tpu as pltpu

_LANE = 128      # vreg lane width
_SUBLANE = 8     # f32 sublane tile


def _round_up(x, m):
    return (x + m - 1) // m * m


# ---------------------------------------------------------------------------
# In-kernel recurrence helper: serial tanh-RNN with `len(hs)` independent,
# interleaved batch sub-chains (hides MXU/EUP latency of the serial chain).
# ---------------------------------------------------------------------------
def _run_rnn(pre_ref, w_hh, hs, t_steps, bb, bc, h_out_ref, unrolled):
    n_chains = len(hs)

    if unrolled:
        for t in range(t_steps):
            new_hs = []
            for c in range(n_chains):
                base = t * bb + c * bc                       # static, 8-aligned
                px = pre_ref[base:base + bc, :]
                h = jnp.tanh(px + jnp.dot(hs[c], w_hh,
                                          preferred_element_type=jnp.float32))
                if h_out_ref is not None:
                    h_out_ref[base:base + bc, :] = h         # lane-dense store
                new_hs.append(h)
            hs = new_hs
        return hs

    # Longer sequences: fori_loop keeps vreg live-ranges bounded; moderate
    # unroll keeps scheduler visibility across iterations.
    def body(t, carry):
        new_hs = []
        for c in range(n_chains):
            base = pl.multiple_of(t * bb + c * bc, _SUBLANE)
            px = pre_ref[pl.ds(base, bc), :]
            h = jnp.tanh(px + jnp.dot(carry[c], w_hh,
                                      preferred_element_type=jnp.float32))
            if h_out_ref is not None:
                h_out_ref[pl.ds(base, bc), :] = h
            new_hs.append(h)
        return tuple(new_hs)

    return list(lax.fori_loop(0, t_steps, body, tuple(hs), unroll=4))


# ---------------------------------------------------------------------------
# Pallas kernel (one grid step = one batch block run through enc+dec+FC).
# ---------------------------------------------------------------------------
def _seq2seq_kernel(
    enc_in_ref,   # (Te*Bb, C)   VMEM  time-major encoder input rows (f32/bf16)
    dec_in_ref,   # (Td*Bb, C)   VMEM  time-major decoder input rows (f32/bf16)
    h0_ref,       # (Bb, Hp)     VMEM  initial encoder hidden (f32, lane-padded)
    w_ih_e_ref,   # (C, Hp)      VMEM  encoder input->hidden (pre-transposed, padded)
    w_hh_e_ref,   # (Hp, Hp)     VMEM  encoder hidden->hidden (f32, padded)
    b_e_ref,      # (1, Hp)      VMEM  encoder bias (b_ih + b_hh)
    w_ih_d_ref,   # (C, Hp)      VMEM  decoder input->hidden
    w_hh_d_ref,   # (Hp, Hp)     VMEM  decoder hidden->hidden
    b_d_ref,      # (1, Hp)      VMEM  decoder bias
    w_fc_ref,     # (Hp, Cp)     VMEM  fc weight (pre-transposed, padded)
    b_fc_ref,     # (1, Cp)      VMEM  fc bias
    out_ref,      # (Td*Bb, Cp)  VMEM  output (lane-dense)
    pre_enc,      # (Te*Bb, Hp)  VMEM scratch: hoisted encoder x-projections
    pre_dec,      # (Td*Bb, Hp)  VMEM scratch: hoisted decoder x-projections
    h_all,        # (Td*Bb, Hp)  VMEM scratch: decoder hidden states
    *, n_chains, unrolled,
):
    bb = h0_ref.shape[0]
    t_enc = pre_enc.shape[0] // bb
    t_dec = pre_dec.shape[0] // bb
    bc = bb // n_chains

    # --- hoisted input->hidden projections: two big MXU matmuls (bf16 inputs
    #     allowed, f32 accumulation), off the recurrent critical path. --------
    pre_enc[...] = (
        jnp.dot(enc_in_ref[...], w_ih_e_ref[...], preferred_element_type=jnp.float32)
        + b_e_ref[...]
    )
    pre_dec[...] = (
        jnp.dot(dec_in_ref[...], w_ih_d_ref[...], preferred_element_type=jnp.float32)
        + b_d_ref[...]
    )

    w_hh_e = w_hh_e_ref[...]
    w_hh_d = w_hh_d_ref[...]

    # --- recurrences: h carried as vreg-resident values, independent batch
    #     sub-chains interleaved; recurrence math stays f32. ------------------
    hs = [h0_ref[c * bc:(c + 1) * bc, :] for c in range(n_chains)]
    hs = _run_rnn(pre_enc, w_hh_e, hs, t_enc, bb, bc, None, unrolled)
    _ = _run_rnn(pre_dec, w_hh_d, hs, t_dec, bb, bc, h_all, unrolled)

    # --- hoisted FC head: one (Td*Bb,Hp)@(Hp,Cp) matmul + one bulk lane-dense
    #     store. --------------------------------------------------------------
    out_ref[...] = (
        jnp.dot(h_all[...].astype(w_fc_ref.dtype), w_fc_ref[...],
                preferred_element_type=jnp.float32)
        + b_fc_ref[...]
    ).astype(out_ref.dtype)


# ---------------------------------------------------------------------------
# Wrapper: matches the PyTorch module's forward(enc_input, enc_hidden, dec_input).
# ---------------------------------------------------------------------------
@functools.partial(jax.jit,
                   static_argnames=("num_blocks", "use_bf16", "unroll_threshold"))
def seq2seq_forward(enc_input, enc_hidden, dec_input, params, *,
                    num_blocks=1, use_bf16=False, unroll_threshold=16):
    """enc_input: (B, Te, C)  enc_hidden: (1, B, H)  dec_input: (B, Td, C)
    returns: (Td, B, C) — same (time-major) output as the PyTorch module.

    num_blocks: leading grid axis splitting the batch (use 2 on v7x megacore).
    use_bf16:   bf16 inputs/weights for the bulk matmuls (f32 accumulation)."""
    batch, t_enc, char_size = enc_input.shape
    _, t_dec, _ = dec_input.shape
    n_hidden = enc_hidden.shape[-1]
    f32 = jnp.float32
    in_dtype = jnp.bfloat16 if use_bf16 else f32

    # Lane-dense padding of the hidden / output feature dims (free at H,C<=128
    # since vregs are 128 lanes anyway; turns masked stores into full `vst`).
    hp = _round_up(n_hidden, _LANE)
    cp = _round_up(char_size, _LANE)
    bp = _round_up(batch, _SUBLANE * num_blocks)     # sublane-aligned batch
    bb = bp // num_blocks                            # batch rows per grid block
    n_chains = 2 if bb % (2 * _SUBLANE) == 0 else 1  # interleaved sub-chains
    unrolled = max(t_enc, t_dec) <= unroll_threshold

    def pad2(x, rows, cols, dtype=f32):
        x = x.astype(dtype)
        return jnp.pad(x, ((0, rows - x.shape[0]), (0, cols - x.shape[1])))

    # (B,T,C) -> batch-pad -> per-block time-major rows: (num_blocks, T*Bb, C)
    def to_blocks(x, t_steps):
        x = jnp.pad(x.astype(in_dtype), ((0, bp - batch), (0, 0), (0, 0)))
        x = x.reshape(num_blocks, bb, t_steps, char_size)
        x = jnp.transpose(x, (0, 2, 1, 3))
        return x.reshape(num_blocks, t_steps * bb, char_size)
    # TODO(synk): fold this time-major relayout into the kernel's DMA/index_map
    # (extra HBM pass only matters at much larger T*B*C).

    enc_blk = to_blocks(enc_input, t_enc)
    dec_blk = to_blocks(dec_input, t_dec)
    h0_blk = pad2(enc_hidden[0], bp, hp).reshape(num_blocks, bb, hp)

    w_ih_e = pad2(params["w_ih_e"], char_size, hp, in_dtype)
    w_hh_e = pad2(params["w_hh_e"], hp, hp)              # recurrence stays f32
    b_e = pad2(params["b_e"], 1, hp)
    w_ih_d = pad2(params["w_ih_d"], char_size, hp, in_dtype)
    w_hh_d = pad2(params["w_hh_d"], hp, hp)
    b_d = pad2(params["b_d"], 1, hp)
    w_fc = pad2(params["w_fc"], hp, cp, in_dtype)
    b_fc = pad2(params["b_fc"], 1, cp)

    # BlockSpecs: per-batch-block arrays blocked along the leading (grid) dim;
    # weights/biases resident (same full block every grid step).
    def blocked(rows, cols):
        return pl.BlockSpec((None, rows, cols), lambda i: (i, 0, 0))

    def resident(shape):
        return pl.BlockSpec(shape, lambda i: (0,) * len(shape))

    in_specs = [
        blocked(t_enc * bb, char_size),
        blocked(t_dec * bb, char_size),
        blocked(bb, hp),
        resident(w_ih_e.shape), resident(w_hh_e.shape), resident(b_e.shape),
        resident(w_ih_d.shape), resident(w_hh_d.shape), resident(b_d.shape),
        resident(w_fc.shape), resident(b_fc.shape),
    ]
    out_spec = blocked(t_dec * bb, cp)

    scratch_shapes = [
        pltpu.VMEM((t_enc * bb, hp), f32),   # pre_enc
        pltpu.VMEM((t_dec * bb, hp), f32),   # pre_dec
        pltpu.VMEM((t_dec * bb, hp), f32),   # h_all
    ]

    # Explicit VMEM budget sized from the actual buffers (v5e default is 16MiB).
    mm_bytes = 2 if use_bf16 else 4
    io_bytes = (
        t_enc * bb * char_size * mm_bytes + t_dec * bb * char_size * mm_bytes
        + bb * hp * 4
        + (w_ih_e.size + w_ih_d.size + w_fc.size) * mm_bytes
        + (w_hh_e.size + w_hh_d.size + b_e.size + b_d.size + b_fc.size) * 4
        + t_dec * bb * cp * 4
    )
    scratch_bytes = (t_enc + 2 * t_dec) * bb * hp * 4
    vmem_limit = int(min(100 * 2**20,
                         max(2 * io_bytes + scratch_bytes + (4 << 20), 16 * 2**20)))

    flops = 2 * bp * (
        t_enc * char_size * hp + t_enc * hp * hp
        + t_dec * char_size * hp + t_dec * hp * hp + t_dec * hp * cp
    )
    cost = pl.CostEstimate(
        flops=flops,
        transcendentals=(t_enc + t_dec) * bp * hp,
        bytes_accessed=num_blocks * io_bytes,
    )

    kernel = functools.partial(_seq2seq_kernel, n_chains=n_chains, unrolled=unrolled)
    out = pl.pallas_call(
        kernel,
        out_shape=jax.ShapeDtypeStruct((num_blocks, t_dec * bb, cp), f32),
        grid=(num_blocks,),
        in_specs=in_specs,
        out_specs=out_spec,
        scratch_shapes=scratch_shapes,
        compiler_params=pltpu.CompilerParams(
            dimension_semantics=("parallel",),
            vmem_limit_bytes=vmem_limit,
        ),
        cost_estimate=cost,
    )(enc_blk, dec_blk, h0_blk,
      w_ih_e, w_hh_e, b_e, w_ih_d, w_hh_d, b_d, w_fc, b_fc)

    # (num_blocks, Td*Bb, Cp) -> (Td, B, C), dropping batch/lane padding.
    out = out.reshape(num_blocks, t_dec, bb, cp)
    out = jnp.transpose(out, (1, 0, 2, 3)).reshape(t_dec, bp, cp)
    return out[:, :batch, :char_size]


# ---------------------------------------------------------------------------
# Pure-JAX reference (mirrors torch.nn.RNN + nn.Linear) for verification.
# ---------------------------------------------------------------------------
def seq2seq_reference(enc_input, enc_hidden, dec_input, params):
    enc_tm = jnp.transpose(enc_input, (1, 0, 2))
    dec_tm = jnp.transpose(dec_input, (1, 0, 2))
    h = enc_hidden[0]

    def enc_cell(h, x):
        h = jnp.tanh(x @ params["w_ih_e"] + h @ params["w_hh_e"] + params["b_e"])
        return h, None

    h, _ = lax.scan(enc_cell, h, enc_tm)

    def dec_cell(h, x):
        h = jnp.tanh(x @ params["w_ih_d"] + h @ params["w_hh_d"] + params["b_d"])
        return h, h

    _, outs = lax.scan(dec_cell, h, dec_tm)          # (Td, B, H)
    return outs @ params["w_fc"] + params["b_fc"]    # (Td, B, C)


# ---------------------------------------------------------------------------
# Deterministic parameter init (PyTorch-style uniform(-1/sqrt(H), 1/sqrt(H))).
# ---------------------------------------------------------------------------
def init_params(key, char_size, n_hidden):
    bound = 1.0 / jnp.sqrt(jnp.float32(n_hidden))
    keys = jax.random.split(key, 10)

    def u(k, shape):
        return jax.random.uniform(k, shape, jnp.float32, -bound, bound)

    # Weights stored pre-transposed for row-major matmul inside the kernel.
    return {
        "w_ih_e": u(keys[0], (char_size, n_hidden)),
        "w_hh_e": u(keys[1], (n_hidden, n_hidden)),
        "b_e": u(keys[2], (1, n_hidden)) + u(keys[3], (1, n_hidden)),  # b_ih + b_hh
        "w_ih_d": u(keys[4], (char_size, n_hidden)),
        "w_hh_d": u(keys[5], (n_hidden, n_hidden)),
        "b_d": u(keys[6], (1, n_hidden)) + u(keys[7], (1, n_hidden)),
        "w_fc": u(keys[8], (n_hidden, char_size)),
        "b_fc": u(keys[9], (1, char_size)),
    }


if __name__ == "__main__":
    key = jax.random.PRNGKey(0)

    def make_case(k, batch, t_enc, t_dec, char_size, n_hidden):
        k_e, k_d, k_h, k_p = jax.random.split(k, 4)
        enc = jax.random.normal(k_e, (batch, t_enc, char_size), jnp.float32)
        dec = jax.random.normal(k_d, (batch, t_dec, char_size), jnp.float32)
        h0 = jax.random.normal(k_h, (1, batch, n_hidden), jnp.float32)
        prm = init_params(k_p, char_size, n_hidden)
        return enc, h0, dec, prm

    k1, k2 = jax.random.split(key)

    # Case 1: small shapes, f32 everywhere, fully-unrolled recurrence,
    # single batch block, single chain. Strict numerical check.
    enc, h0, dec, prm = make_case(k1, 8, 8, 8, 32, 32)
    out = jax.block_until_ready(seq2seq_forward(enc, h0, dec, prm))
    ref = seq2seq_reference(enc, h0, dec, prm)
    assert out.shape == (8, 8, 32), out.shape
    assert jnp.allclose(out, ref, atol=1e-5, rtol=1e-5), float(jnp.abs(out - ref).max())

    # Case 2: longer sequences + bf16 bulk matmuls (f32 accumulation),
    # fori_loop recurrence, 2 batch blocks (megacore-style grid), 2 interleaved
    # sub-chains per block. Looser tolerance (bf16 projections).
    enc, h0, dec, prm = make_case(k2, 32, 24, 20, 32, 48)
    out = jax.block_until_ready(
        seq2seq_forward(enc, h0, dec, prm, num_blocks=2, use_bf16=True))
    ref = seq2seq_reference(enc, h0, dec, prm)
    assert out.shape == (20, 32, 32), out.shape
    assert jnp.allclose(out, ref, atol=1e-1, rtol=1e-1), float(jnp.abs(out - ref).max())

    print("KERNEL_OK")
</pallas_src>

<mosaic_0001>
module attributes {stable_mosaic.version = 11 : i64} {
  func.func @_seq2seq_kernel(%arg0: i32, %arg1: memref<1x64x32xf32, #tpu.memory_space<vmem>>, %arg2: memref<1x64x32xf32, #tpu.memory_space<vmem>>, %arg3: memref<1x8x128xf32, #tpu.memory_space<vmem>>, %arg4: memref<32x128xf32, #tpu.memory_space<vmem>>, %arg5: memref<128x128xf32, #tpu.memory_space<vmem>>, %arg6: memref<1x128xf32, #tpu.memory_space<vmem>>, %arg7: memref<32x128xf32, #tpu.memory_space<vmem>>, %arg8: memref<128x128xf32, #tpu.memory_space<vmem>>, %arg9: memref<1x128xf32, #tpu.memory_space<vmem>>, %arg10: memref<128x128xf32, #tpu.memory_space<vmem>>, %arg11: memref<1x128xf32, #tpu.memory_space<vmem>>, %arg12: memref<1x64x128xf32, #tpu.memory_space<vmem>>, %arg13: memref<64x128xf32, #tpu.memory_space<vmem>>, %arg14: memref<64x128xf32, #tpu.memory_space<vmem>>, %arg15: memref<64x128xf32, #tpu.memory_space<vmem>>) attributes {dimension_semantics = [#tpu.dimension_semantics<parallel>], iteration_bounds = array<i64: 1>, scalar_prefetch = 0 : i64, scratch_operands = 3 : i64, tpu.core_type = #tpu.core_type<tc>, window_params = [{transform_indices = @transform_0, window_bounds = array<i64: 1, 64, 32>}, {transform_indices = @transform_1, window_bounds = array<i64: 1, 64, 32>}, {transform_indices = @transform_2, window_bounds = array<i64: 1, 8, 128>}, {pipeline_mode = #tpu.pipeline_mode<synchronous>, transform_indices = @transform_3, window_bounds = array<i64: 32, 128>}, {pipeline_mode = #tpu.pipeline_mode<synchronous>, transform_indices = @transform_4, window_bounds = array<i64: 128, 128>}, {pipeline_mode = #tpu.pipeline_mode<synchronous>, transform_indices = @transform_5, window_bounds = array<i64: 1, 128>}, {pipeline_mode = #tpu.pipeline_mode<synchronous>, transform_indices = @transform_6, window_bounds = array<i64: 32, 128>}, {pipeline_mode = #tpu.pipeline_mode<synchronous>, transform_indices = @transform_7, window_bounds = array<i64: 128, 128>}, {pipeline_mode = #tpu.pipeline_mode<synchronous>, transform_indices = @transform_8, window_bounds = array<i64: 1, 128>}, {pipeline_mode = #tpu.pipeline_mode<synchronous>, transform_indices = @transform_9, window_bounds = array<i64: 128, 128>}, {pipeline_mode = #tpu.pipeline_mode<synchronous>, transform_indices = @transform_10, window_bounds = array<i64: 1, 128>}, {transform_indices = @transform_11, window_bounds = array<i64: 1, 64, 128>}]} {
    %c0 = arith.constant 0 : index
    %c0_0 = arith.constant 0 : index
    %c0_1 = arith.constant 0 : index
    %0 = vector.load %arg1[%c0, %c0_0, %c0_1] : memref<1x64x32xf32, #tpu.memory_space<vmem>>, vector<1x64x32xf32>
    %1 = vector.shape_cast %0 : vector<1x64x32xf32> to vector<64x32xf32>
    %c0_2 = arith.constant 0 : index
    %c0_3 = arith.constant 0 : index
    %2 = vector.load %arg4[%c0_2, %c0_3] : memref<32x128xf32, #tpu.memory_space<vmem>>, vector<32x128xf32>
    %cst = arith.constant dense<0.000000e+00> : vector<64x128xf32>
    %3 = tpu.matmul %1, %2, %cst {dimension_numbers = #tpu.dot_dimension_numbers<[1], [0], [0], [1], [0, 0, 1, 1], [], []>} : vector<64x32xf32>, vector<32x128xf32>, vector<64x128xf32> -> vector<64x128xf32>
    %c0_4 = arith.constant 0 : index
    %c0_5 = arith.constant 0 : index
    %4 = vector.load %arg6[%c0_4, %c0_5] : memref<1x128xf32, #tpu.memory_space<vmem>>, vector<1x128xf32>
    %5 = vector.broadcast %4 : vector<1x128xf32> to vector<64x128xf32>
    %6 = arith.addf %3, %5 : vector<64x128xf32>
    %c0_6 = arith.constant 0 : index
    %c0_7 = arith.constant 0 : index
    %7 = vector.load %arg13[%c0_6, %c0_7] : memref<64x128xf32, #tpu.memory_space<vmem>>, vector<64x128xf32>
    tpu.vector_store %arg13[%c0_6, %c0_7], %6 {strides = array<i32>} : memref<64x128xf32, #tpu.memory_space<vmem>>, vector<64x128xf32>,
    %c0_8 = arith.constant 0 : index
    %c0_9 = arith.constant 0 : index
    %c0_10 = arith.constant 0 : index
    %8 = vector.load %arg2[%c0_8, %c0_9, %c0_10] : memref<1x64x32xf32, #tpu.memory_space<vmem>>, vector<1x64x32xf32>
    %9 = vector.shape_cast %8 : vector<1x64x32xf32> to vector<64x32xf32>
    %c0_11 = arith.constant 0 : index
    %c0_12 = arith.constant 0 : index
    %10 = vector.load %arg7[%c0_11, %c0_12] : memref<32x128xf32, #tpu.memory_space<vmem>>, vector<32x128xf32>
    %cst_13 = arith.constant dense<0.000000e+00> : vector<64x128xf32>
    %11 = tpu.matmul %9, %10, %cst_13 {dimension_numbers = #tpu.dot_dimension_numbers<[1], [0], [0], [1], [0, 0, 1, 1], [], []>} : vector<64x32xf32>, vector<32x128xf32>, vector<64x128xf32> -> vector<64x128xf32>
    %c0_14 = arith.constant 0 : index
    %c0_15 = arith.constant 0 : index
    %12 = vector.load %arg9[%c0_14, %c0_15] : memref<1x128xf32, #tpu.memory_space<vmem>>, vector<1x128xf32>
    %13 = vector.broadcast %12 : vector<1x128xf32> to vector<64x128xf32>
    %14 = arith.addf %11, %13 : vector<64x128xf32>
    %c0_16 = arith.constant 0 : index
    %c0_17 = arith.constant 0 : index
    %15 = vector.load %arg14[%c0_16, %c0_17] : memref<64x128xf32, #tpu.memory_space<vmem>>, vector<64x128xf32>
    tpu.vector_store %arg14[%c0_16, %c0_17], %14 {strides = array<i32>} : memref<64x128xf32, #tpu.memory_space<vmem>>, vector<64x128xf32>,
    %c0_18 = arith.constant 0 : index
    %c0_19 = arith.constant 0 : index
    %16 = vector.load %arg5[%c0_18, %c0_19] : memref<128x128xf32, #tpu.memory_space<vmem>>, vector<128x128xf32>
    %c0_20 = arith.constant 0 : index
    %c0_21 = arith.constant 0 : index
    %17 = vector.load %arg8[%c0_20, %c0_21] : memref<128x128xf32, #tpu.memory_space<vmem>>, vector<128x128xf32>
    %c0_22 = arith.constant 0 : index
    %c0_23 = arith.constant 0 : index
    %c0_24 = arith.constant 0 : index
    %18 = vector.load %arg3[%c0_22, %c0_23, %c0_24] : memref<1x8x128xf32, #tpu.memory_space<vmem>>, vector<1x8x128xf32>
    %19 = vector.shape_cast %18 : vector<1x8x128xf32> to vector<8x128xf32>
    %c0_25 = arith.constant 0 : index
    %c0_26 = arith.constant 0 : index
    %20 = vector.load %arg13[%c0_25, %c0_26] : memref<64x128xf32, #tpu.memory_space<vmem>>, vector<8x128xf32>
    %cst_27 = arith.constant dense<0.000000e+00> : vector<8x128xf32>
    %21 = tpu.matmul %19, %16, %cst_27 {dimension_numbers = #tpu.dot_dimension_numbers<[1], [0], [0], [1], [0, 0, 1, 1], [], []>} : vector<8x128xf32>, vector<128x128xf32>, vector<8x128xf32> -> vector<8x128xf32>
    %22 = arith.addf %20, %21 : vector<8x128xf32>
    %23 = math.tanh %22 : vector<8x128xf32>
    %c8 = arith.constant 8 : index
    %c0_28 = arith.constant 0 : index
    %24 = vector.load %arg13[%c8, %c0_28] : memref<64x128xf32, #tpu.memory_space<vmem>>, vector<8x128xf32>
    %cst_29 = arith.constant dense<0.000000e+00> : vector<8x128xf32>
    %25 = tpu.matmul %23, %16, %cst_29 {dimension_numbers = #tpu.dot_dimension_numbers<[1], [0], [0], [1], [0, 0, 1, 1], [], []>} : vector<8x128xf32>, vector<128x128xf32>, vector<8x128xf32> -> vector<8x128xf32>
    %26 = arith.addf %24, %25 : vector<8x128xf32>
    %27 = math.tanh %26 : vector<8x128xf32>
    %c16 = arith.constant 16 : index
    %c0_30 = arith.constant 0 : index
    %28 = vector.load %arg13[%c16, %c0_30] : memref<64x128xf32, #tpu.memory_space<vmem>>, vector<8x128xf32>
    %cst_31 = arith.constant dense<0.000000e+00> : vector<8x128xf32>
    %29 = tpu.matmul %27, %16, %cst_31 {dimension_numbers = #tpu.dot_dimension_numbers<[1], [0], [0], [1], [0, 0, 1, 1], [], []>} : vector<8x128xf32>, vector<128x128xf32>, vector<8x128xf32> -> vector<8x128xf32>
    %30 = arith.addf %28, %29 : vector<8x128xf32>
    %31 = math.tanh %30 : vector<8x128xf32>
    %c24 = arith.constant 24 : index
    %c0_32 = arith.constant 0 : index
    %32 = vector.load %arg13[%c24, %c0_32] : memref<64x128xf32, #tpu.memory_space<vmem>>, vector<8x128xf32>
    %cst_33 = arith.constant dense<0.000000e+00> : vector<8x128xf32>
    %33 = tpu.matmul %31, %16, %cst_33 {dimension_numbers = #tpu.dot_dimension_numbers<[1], [0], [0], [1], [0, 0, 1, 1], [], []>} : vector<8x128xf32>, vector<128x128xf32>, vector<8x128xf32> -> vector<8x128xf32>
    %34 = arith.addf %32, %33 : vector<8x128xf32>
    %35 = math.tanh %34 : vector<8x128xf32>
    %c32 = arith.constant 32 : index
    %c0_34 = arith.constant 0 : index
    %36 = vector.load %arg13[%c32, %c0_34] : memref<64x128xf32, #tpu.memory_space<vmem>>, vector<8x128xf32>
    %cst_35 = arith.constant dense<0.000000e+00> : vector<8x128xf32>
    %37 = tpu.matmul %35, %16, %cst_35 {dimension_numbers = #tpu.dot_dimension_numbers<[1], [0], [0], [1], [0, 0, 1, 1], [], []>} : vector<8x128xf32>, vector<128x128xf32>, vector<8x128xf32> -> vector<8x128xf32>
    %38 = arith.addf %36, %37 : vector<8x128xf32>
    %39 = math.tanh %38 : vector<8x128xf32>
    %c40 = arith.constant 40 : index
    %c0_36 = arith.constant 0 : index
    %40 = vector.load %arg13[%c40, %c0_36] : memref<64x128xf32, #tpu.memory_space<vmem>>, vector<8x128xf32>
    %cst_37 = arith.constant dense<0.000000e+00> : vector<8x128xf32>
    %41 = tpu.matmul %39, %16, %cst_37 {dimension_numbers = #tpu.dot_dimension_numbers<[1], [0], [0], [1], [0, 0, 1, 1], [], []>} : vector<8x128xf32>, vector<128x128xf32>, vector<8x128xf32> -> vector<8x128xf32>
    %42 = arith.addf %40, %41 : vector<8x128xf32>
    %43 = math.tanh %42 : vector<8x128xf32>
    %c48 = arith.constant 48 : index
    %c0_38 = arith.constant 0 : index
    %44 = vector.load %arg13[%c48, %c0_38] : memref<64x128xf32, #tpu.memory_space<vmem>>, vector<8x128xf32>
    %cst_39 = arith.constant dense<0.000000e+00> : vector<8x128xf32>
    %45 = tpu.matmul %43, %16, %cst_39 {dimension_numbers = #tpu.dot_dimension_numbers<[1], [0], [0], [1], [0, 0, 1, 1], [], []>} : vector<8x128xf32>, vector<128x128xf32>, vector<8x128xf32> -> vector<8x128xf32>
    %46 = arith.addf %44, %45 : vector<8x128xf32>
    %47 = math.tanh %46 : vector<8x128xf32>
    %c56 = arith.constant 56 : index
    %c0_40 = arith.constant 0 : index
    %48 = vector.load %arg13[%c56, %c0_40] : memref<64x128xf32, #tpu.memory_space<vmem>>, vector<8x128xf32>
    %cst_41 = arith.constant dense<0.000000e+00> : vector<8x128xf32>
    %49 = tpu.matmul %47, %16, %cst_41 {dimension_numbers = #tpu.dot_dimension_numbers<[1], [0], [0], [1], [0, 0, 1, 1], [], []>} : vector<8x128xf32>, vector<128x128xf32>, vector<8x128xf32> -> vector<8x128xf32>
    %50 = arith.addf %48, %49 : vector<8x128xf32>
    %51 = math.tanh %50 : vector<8x128xf32>
    %c0_42 = arith.constant 0 : index
    %c0_43 = arith.constant 0 : index
    %52 = vector.load %arg14[%c0_42, %c0_43] : memref<64x128xf32, #tpu.memory_space<vmem>>, vector<8x128xf32>
    %cst_44 = arith.constant dense<0.000000e+00> : vector<8x128xf32>
    %53 = tpu.matmul %51, %17, %cst_44 {dimension_numbers = #tpu.dot_dimension_numbers<[1], [0], [0], [1], [0, 0, 1, 1], [], []>} : vector<8x128xf32>, vector<128x128xf32>, vector<8x128xf32> -> vector<8x128xf32>
    %54 = arith.addf %52, %53 : vector<8x128xf32>
    %55 = math.tanh %54 : vector<8x128xf32>
    %c0_45 = arith.constant 0 : index
    %c0_46 = arith.constant 0 : index
    %56 = vector.load %arg15[%c0_45, %c0_46] : memref<64x128xf32, #tpu.memory_space<vmem>>, vector<8x128xf32>
    tpu.vector_store %arg15[%c0_45, %c0_46], %55 {strides = array<i32>} : memref<64x128xf32, #tpu.memory_space<vmem>>, vector<8x128xf32>,
    %c8_47 = arith.constant 8 : index
    %c0_48 = arith.constant 0 : index
    %57 = vector.load %arg14[%c8_47, %c0_48] : memref<64x128xf32, #tpu.memory_space<vmem>>, vector<8x128xf32>
    %cst_49 = arith.constant dense<0.000000e+00> : vector<8x128xf32>
    %58 = tpu.matmul %55, %17, %cst_49 {dimension_numbers = #tpu.dot_dimension_numbers<[1], [0], [0], [1], [0, 0, 1, 1], [], []>} : vector<8x128xf32>, vector<128x128xf32>, vector<8x128xf32> -> vector<8x128xf32>
    %59 = arith.addf %57, %58 : vector<8x128xf32>
    %60 = math.tanh %59 : vector<8x128xf32>
    %c8_50 = arith.constant 8 : index
    %c0_51 = arith.constant 0 : index
    %61 = vector.load %arg15[%c8_50, %c0_51] : memref<64x128xf32, #tpu.memory_space<vmem>>, vector<8x128xf32>
    tpu.vector_store %arg15[%c8_50, %c0_51], %60 {strides = array<i32>} : memref<64x128xf32, #tpu.memory_space<vmem>>, vector<8x128xf32>,
    %c16_52 = arith.constant 16 : index
    %c0_53 = arith.constant 0 : index
    %62 = vector.load %arg14[%c16_52, %c0_53] : memref<64x128xf32, #tpu.memory_space<vmem>>, vector<8x128xf32>
    %cst_54 = arith.constant dense<0.000000e+00> : vector<8x128xf32>
    %63 = tpu.matmul %60, %17, %cst_54 {dimension_numbers = #tpu.dot_dimension_numbers<[1], [0], [0], [1], [0, 0, 1, 1], [], []>} : vector<8x128xf32>, vector<128x128xf32>, vector<8x128xf32> -> vector<8x128xf32>
    %64 = arith.addf %62, %63 : vector<8x128xf32>
    %65 = math.tanh %64 : vector<8x128xf32>
    %c16_55 = arith.constant 16 : index
    %c0_56 = arith.constant 0 : index
    %66 = vector.load %arg15[%c16_55, %c0_56] : memref<64x128xf32, #tpu.memory_space<vmem>>, vector<8x128xf32>
    tpu.vector_store %arg15[%c16_55, %c0_56], %65 {strides = array<i32>} : memref<64x128xf32, #tpu.memory_space<vmem>>, vector<8x128xf32>,
    %c24_57 = arith.constant 24 : index
    %c0_58 = arith.constant 0 : index
    %67 = vector.load %arg14[%c24_57, %c0_58] : memref<64x128xf32, #tpu.memory_space<vmem>>, vector<8x128xf32>
    %cst_59 = arith.constant dense<0.000000e+00> : vector<8x128xf32>
    %68 = tpu.matmul %65, %17, %cst_59 {dimension_numbers = #tpu.dot_dimension_numbers<[1], [0], [0], [1], [0, 0, 1, 1], [], []>} : vector<8x128xf32>, vector<128x128xf32>, vector<8x128xf32> -> vector<8x128xf32>
    %69 = arith.addf %67, %68 : vector<8x128xf32>
    %70 = math.tanh %69 : vector<8x128xf32>
    %c24_60 = arith.constant 24 : index
    %c0_61 = arith.constant 0 : index
    %71 = vector.load %arg15[%c24_60, %c0_61] : memref<64x128xf32, #tpu.memory_space<vmem>>, vector<8x128xf32>
    tpu.vector_store %arg15[%c24_60, %c0_61], %70 {strides = array<i32>} : memref<64x128xf32, #tpu.memory_space<vmem>>, vector<8x128xf32>,
    %c32_62 = arith.constant 32 : index
    %c0_63 = arith.constant 0 : index
    %72 = vector.load %arg14[%c32_62, %c0_63] : memref<64x128xf32, #tpu.memory_space<vmem>>, vector<8x128xf32>
    %cst_64 = arith.constant dense<0.000000e+00> : vector<8x128xf32>
    %73 = tpu.matmul %70, %17, %cst_64 {dimension_numbers = #tpu.dot_dimension_numbers<[1], [0], [0], [1], [0, 0, 1, 1], [], []>} : vector<8x128xf32>, vector<128x128xf32>, vector<8x128xf32> -> vector<8x128xf32>
    %74 = arith.addf %72, %73 : vector<8x128xf32>
    %75 = math.tanh %74 : vector<8x128xf32>
    %c32_65 = arith.constant 32 : index
    %c0_66 = arith.constant 0 : index
    %76 = vector.load %arg15[%c32_65, %c0_66] : memref<64x128xf32, #tpu.memory_space<vmem>>, vector<8x128xf32>
    tpu.vector_store %arg15[%c32_65, %c0_66], %75 {strides = array<i32>} : memref<64x128xf32, #tpu.memory_space<vmem>>, vector<8x128xf32>,
    %c40_67 = arith.constant 40 : index
    %c0_68 = arith.constant 0 : index
    %77 = vector.load %arg14[%c40_67, %c0_68] : memref<64x128xf32, #tpu.memory_space<vmem>>, vector<8x128xf32>
    %cst_69 = arith.constant dense<0.000000e+00> : vector<8x128xf32>
    %78 = tpu.matmul %75, %17, %cst_69 {dimension_numbers = #tpu.dot_dimension_numbers<[1], [0], [0], [1], [0, 0, 1, 1], [], []>} : vector<8x128xf32>, vector<128x128xf32>, vector<8x128xf32> -> vector<8x128xf32>
    %79 = arith.addf %77, %78 : vector<8x128xf32>
    %80 = math.tanh %79 : vector<8x128xf32>
    %c40_70 = arith.constant 40 : index
    %c0_71 = arith.constant 0 : index
    %81 = vector.load %arg15[%c40_70, %c0_71] : memref<64x128xf32, #tpu.memory_space<vmem>>, vector<8x128xf32>
    tpu.vector_store %arg15[%c40_70, %c0_71], %80 {strides = array<i32>} : memref<64x128xf32, #tpu.memory_space<vmem>>, vector<8x128xf32>,
    %c48_72 = arith.constant 48 : index
    %c0_73 = arith.constant 0 : index
    %82 = vector.load %arg14[%c48_72, %c0_73] : memref<64x128xf32, #tpu.memory_space<vmem>>, vector<8x128xf32>
    %cst_74 = arith.constant dense<0.000000e+00> : vector<8x128xf32>
    %83 = tpu.matmul %80, %17, %cst_74 {dimension_numbers = #tpu.dot_dimension_numbers<[1], [0], [0], [1], [0, 0, 1, 1], [], []>} : vector<8x128xf32>, vector<128x128xf32>, vector<8x128xf32> -> vector<8x128xf32>
    %84 = arith.addf %82, %83 : vector<8x128xf32>
    %85 = math.tanh %84 : vector<8x128xf32>
    %c48_75 = arith.constant 48 : index
    %c0_76 = arith.constant 0 : index
    %86 = vector.load %arg15[%c48_75, %c0_76] : memref<64x128xf32, #tpu.memory_space<vmem>>, vector<8x128xf32>
    tpu.vector_store %arg15[%c48_75, %c0_76], %85 {strides = array<i32>} : memref<64x128xf32, #tpu.memory_space<vmem>>, vector<8x128xf32>,
    %c56_77 = arith.constant 56 : index
    %c0_78 = arith.constant 0 : index
    %87 = vector.load %arg14[%c56_77, %c0_78] : memref<64x128xf32, #tpu.memory_space<vmem>>, vector<8x128xf32>
    %cst_79 = arith.constant dense<0.000000e+00> : vector<8x128xf32>
    %88 = tpu.matmul %85, %17, %cst_79 {dimension_numbers = #tpu.dot_dimension_numbers<[1], [0], [0], [1], [0, 0, 1, 1], [], []>} : vector<8x128xf32>, vector<128x128xf32>, vector<8x128xf32> -> vector<8x128xf32>
    %89 = arith.addf %87, %88 : vector<8x128xf32>
    %90 = math.tanh %89 : vector<8x128xf32>
    %c56_80 = arith.constant 56 : index
    %c0_81 = arith.constant 0 : index
    %91 = vector.load %arg15[%c56_80, %c0_81] : memref<64x128xf32, #tpu.memory_space<vmem>>, vector<8x128xf32>
    tpu.vector_store %arg15[%c56_80, %c0_81], %90 {strides = array<i32>} : memref<64x128xf32, #tpu.memory_space<vmem>>, vector<8x128xf32>,
    %c0_82 = arith.constant 0 : index
    %c0_83 = arith.constant 0 : index
    %92 = vector.load %arg15[%c0_82, %c0_83] : memref<64x128xf32, #tpu.memory_space<vmem>>, vector<64x128xf32>
    %c0_84 = arith.constant 0 : index
    %c0_85 = arith.constant 0 : index
    %93 = vector.load %arg10[%c0_84, %c0_85] : memref<128x128xf32, #tpu.memory_space<vmem>>, vector<128x128xf32>
    %cst_86 = arith.constant dense<0.000000e+00> : vector<64x128xf32>
    %94 = tpu.matmul %92, %93, %cst_86 {dimension_numbers = #tpu.dot_dimension_numbers<[1], [0], [0], [1], [0, 0, 1, 1], [], []>} : vector<64x128xf32>, vector<128x128xf32>, vector<64x128xf32> -> vector<64x128xf32>
    %c0_87 = arith.constant 0 : index
    %c0_88 = arith.constant 0 : index
    %95 = vector.load %arg11[%c0_87, %c0_88] : memref<1x128xf32, #tpu.memory_space<vmem>>, vector<1x128xf32>
    %96 = vector.broadcast %95 : vector<1x128xf32> to vector<64x128xf32>
    %97 = arith.addf %94, %96 : vector<64x128xf32>
    %c0_89 = arith.constant 0 : index
    %c0_90 = arith.constant 0 : index
    %c0_91 = arith.constant 0 : index
    %98 = vector.load %arg12[%c0_89, %c0_90, %c0_91] : memref<1x64x128xf32, #tpu.memory_space<vmem>>, vector<1x64x128xf32>
    %99 = vector.shape_cast %98 : vector<1x64x128xf32> to vector<64x128xf32>
    %100 = vector.shape_cast %97 : vector<64x128xf32> to vector<1x64x128xf32>
    tpu.vector_store %arg12[%c0_89, %c0_90, %c0_91], %100 {strides = array<i32>} : memref<1x64x128xf32, #tpu.memory_space<vmem>>, vector<1x64x128xf32>,
    return
  }
  func.func @transform_0(%arg0: i32) -> (i32, i32, i32) {
    %c0_i32 = arith.constant 0 : i32
    %c0_i32_0 = arith.constant 0 : i32
    %c0_i32_1 = arith.constant 0 : i32
    return %arg0, %c0_i32, %c0_i32_0 : i32, i32, i32
  }
  func.func @transform_1(%arg0: i32) -> (i32, i32, i32) {
    %c0_i32 = arith.constant 0 : i32
    %c0_i32_0 = arith.constant 0 : i32
    %c0_i32_1 = arith.constant 0 : i32
    return %arg0, %c0_i32, %c0_i32_0 : i32, i32, i32
  }
  func.func @transform_2(%arg0: i32) -> (i32, i32, i32) {
    %c0_i32 = arith.constant 0 : i32
    %c0_i32_0 = arith.constant 0 : i32
    %c0_i32_1 = arith.constant 0 : i32
    return %arg0, %c0_i32, %c0_i32_0 : i32, i32, i32
  }
  func.func @transform_3(%arg0: i32) -> (i32, i32) {
    %c0_i32 = arith.constant 0 : i32
    %c0_i32_0 = arith.constant 0 : i32
    %c0_i32_1 = arith.constant 0 : i32
    return %c0_i32, %c0_i32_0 : i32, i32
  }
  func.func @transform_4(%arg0: i32) -> (i32, i32) {
    %c0_i32 = arith.constant 0 : i32
    %c0_i32_0 = arith.constant 0 : i32
    %c0_i32_1 = arith.constant 0 : i32
    return %c0_i32, %c0_i32_0 : i32, i32
  }
  func.func @transform_5(%arg0: i32) -> (i32, i32) {
    %c0_i32 = arith.constant 0 : i32
    %c0_i32_0 = arith.constant 0 : i32
    %c0_i32_1 = arith.constant 0 : i32
    return %c0_i32, %c0_i32_0 : i32, i32
  }
  func.func @transform_6(%arg0: i32) -> (i32, i32) {
    %c0_i32 = arith.constant 0 : i32
    %c0_i32_0 = arith.constant 0 : i32
    %c0_i32_1 = arith.constant 0 : i32
    return %c0_i32, %c0_i32_0 : i32, i32
  }
  func.func @transform_7(%arg0: i32) -> (i32, i32) {
    %c0_i32 = arith.constant 0 : i32
    %c0_i32_0 = arith.constant 0 : i32
    %c0_i32_1 = arith.constant 0 : i32
    return %c0_i32, %c0_i32_0 : i32, i32
  }
  func.func @transform_8(%arg0: i32) -> (i32, i32) {
    %c0_i32 = arith.constant 0 : i32
    %c0_i32_0 = arith.constant 0 : i32
    %c0_i32_1 = arith.constant 0 : i32
    return %c0_i32, %c0_i32_0 : i32, i32
  }
  func.func @transform_9(%arg0: i32) -> (i32, i32) {
    %c0_i32 = arith.constant 0 : i32
    %c0_i32_0 = arith.constant 0 : i32
    %c0_i32_1 = arith.constant 0 : i32
    return %c0_i32, %c0_i32_0 : i32, i32
  }
  func.func @transform_10(%arg0: i32) -> (i32, i32) {
    %c0_i32 = arith.constant 0 : i32
    %c0_i32_0 = arith.constant 0 : i32
    %c0_i32_1 = arith.constant 0 : i32
    return %c0_i32, %c0_i32_0 : i32, i32
  }
  func.func @transform_11(%arg0: i32) -> (i32, i32, i32) {
    %c0_i32 = arith.constant 0 : i32
    %c0_i32_0 = arith.constant 0 : i32
    %c0_i32_1 = arith.constant 0 : i32
    return %arg0, %c0_i32, %c0_i32_0 : i32, i32, i32
  }
}

</mosaic_0001>

<bundles_post_ra>
// kernel: seq2seq_forward.1
= control target key start
LH: loop header
LB: loop body
LE: loop exit
PB: predicated region body
PF: predicated region fallthrough
CT: control target
= control target key end

     0   :  { %v3198_v3 = vmov 0.0|0.0   ;;  %vm3199_vm0 = vmmov 0   ;;  %v3200_v6 = vmov 0.0   ;;  %vm58_vm1 = vcmask 261120   ;;  %s3916_s0 = inlined_call_operand.vmem [shape: f32[1,64,32], index: 0, kind: input, shape index: {}]   ;;  %s3917_s1 = inlined_call_operand.vmem [shape: f32[1,64,32], index: 1, kind: input, shape index: {}]   ;;  %s3918_s2 = inlined_call_operand.vmem [shape: f32[1,8,128], index: 2, kind: input, shape index: {}]   ;;  %s3919_s3 = inlined_call_operand.vmem [shape: f32[32,128], index: 3, kind: input, shape index: {}]   ;;  %s3920_s4 = inlined_call_operand.vmem [shape: f32[128,128], index: 4, kind: input, shape index: {}]   ;;  %s3921_s5 = inlined_call_operand.vmem [shape: f32[1,128], index: 5, kind: input, shape index: {}]   ;;  %s3922_s6 = inlined_call_operand.vmem [shape: f32[32,128], index: 6, kind: input, shape index: {}]   ;;  %s3923_s7 = inlined_call_operand.vmem [shape: f32[128,128], index: 7, kind: input, shape index: {}]   ;;  %s3924_s8 = inlined_call_operand.vmem [shape: f32[1,128], index: 8, kind: input, shape index: {}]   ;;  %s3925_s9 = inlined_call_operand.vmem [shape: f32[128,128], index: 9, kind: input, shape index: {}]   ;;  %s3926_s10 = inlined_call_operand.vmem [shape: f32[1,128], index: 10, kind: input, shape index: {}]   ;;  %s3927_s11 = inlined_call_operand.hbm [shape: f32[1,64,128], index: 11, kind: output, shape index: {}]  }
   0x1   :  { %v352_v0 = vld [vmem:[%s3920_s4] sm:$0xff]  ;;  %v353_v1 = vld [vmem:[%s3920_s4 + $0x8] sm:$0xff]  ;;  %v354_v2 = vld [vmem:[%s3920_s4 + $0x10] sm:$0xff]  ;;  %2720 = vmatprep.subr.bf16.mxu1 %v3198_v3  ;;  %2132 = vmatprep.mubr.msk.f32.mxu1 %vm3199_vm0, %v3200_v6 }
   0x2   :  { %v3274_v4 = vpack.c.bf16 %v353_v1, %v352_v0  ;;  %v355_v5 = vld [vmem:[%s3920_s4 + $0x18] sm:$0xff]  ;;  %v47_v8 = vld [vmem:[%s3919_s3] sm:$0xff]  ;;  %v48_v9 = vld [vmem:[%s3919_s3 + $0x8] sm:$0xff] }
   0x3   :  { %v3282_v7 = vpack.c.bf16 %v355_v5, %v354_v2  ;;  %v356_v10 = vld [vmem:[%s3920_s4 + $0x20] sm:$0xff]  ;;  %v357_v11 = vld [vmem:[%s3920_s4 + $0x28] sm:$0xff]  ;;  %v2704_v12 = vpack.c.bf16 %v48_v9, %v47_v8  ;;  %v49_v13 = vld [vmem:[%s3919_s3 + $0x10] sm:$0xff] }
   0x4   :  { %2722 = vmatpush3.bf16.msra.mxu1 %v3274_v4  ;;  %v50_v14 = vld [vmem:[%s3919_s3 + $0x18] sm:$0xff]  ;;  %v39_v16 = vld [vmem:[%s3916_s0] sm:$0xff]  ;;  %v3307_v17 = vpack.c.bf16 %v357_v11, %v356_v10 }
   0x5   :  { %2723 = vmatprep.subr.bf16.mxu1 %v3198_v3  ;;  %2705 = vmatprep.subr.bf16.mxu0 %v2704_v12  ;;  %v2708_v15 = vpack.c.bf16 %v50_v14, %v49_v13 }
   0x6   :  { %2707 = vmatpush3.bf16.msra.mxu0 %v2704_v12 }
   0x8   :  { %2725 = vmatpush3.bf16.msra.mxu1 %v3282_v7 }
   0x9   :  { %16 = vsyncpa [#allocation6], 0  ;;  %2726 = vmatprep.subr.bf16.mxu1 %v3198_v3  ;;  %v358_v18 = vld [vmem:[%s3920_s4 + $0x30] sm:$0xff]  ;;  %v359_v19 = vld [vmem:[%s3920_s4 + $0x38] sm:$0xff]  ;;  %2709 = vmatprep.subr.bf16.mxu0 %v2708_v15 }
   0xa   :  { %2068 = vmatprep.mubr.msk.f32.mxu0 %vm58_vm1, %v39_v16  ;;  %v3318_v20 = vpack.c.bf16 %v359_v19, %v358_v18  ;;  %2711 = vmatpush3.bf16.msra.mxu0 %v2708_v15  ;;  %v40_v21 = vld [vmem:[%s3916_s0 + $0x8] sm:$0xff]  ;;  %v360_v22 = vld [vmem:[%s3920_s4 + $0x40] sm:$0xff]  ;;  %v362_v25 = vld [vmem:[%s3920_s4 + $0x50] sm:$0xff] }
   0xb   :  { %v361_v23 = vld [vmem:[%s3920_s4 + $0x48] sm:$0xff]  ;;  %v363_v26 = vld [vmem:[%s3920_s4 + $0x58] sm:$0xff]  ;;  %v364_v28 = vld [vmem:[%s3920_s4 + $0x60] sm:$0xff] }
   0xc   :  { %2728 = vmatpush3.bf16.msra.mxu1 %v3307_v17  ;;  %v3332_v24 = vpack.c.bf16 %v361_v23, %v360_v22  ;;  %v3342_v27 = vpack.c.bf16 %v363_v26, %v362_v25  ;;  %v365_v29 = vld [vmem:[%s3920_s4 + $0x68] sm:$0xff]  ;;  %v366_v31 = vld [vmem:[%s3920_s4 + $0x70] sm:$0xff]  ;;  %v367_v32 = vld [vmem:[%s3920_s4 + $0x78] sm:$0xff] }
   0xd   :  { %2729 = vmatprep.subr.bf16.mxu1 %v3198_v3  ;;  %2069 = vmatmul.mubr.msk.f32.vlgmr.msra.gmra.mrb[0].mxu0 %vm58_vm1, %v40_v21  ;;  %v3352_v30 = vpack.c.bf16 %v365_v29, %v364_v28  ;;  %v3362_v33 = vpack.c.bf16 %v367_v32, %v366_v31  ;;  %v384_v34 = vld [vmem:[%s3918_s2] sm:$0xff]  ;;  %v205_v36 = vld [vmem:[%s3922_s6 + $0x8] sm:$0xff]  ;;  %v41_v37 = vld [vmem:[%s3916_s0 + $0x10] sm:$0xff] }
   0xe   :  { %v204_v35 = vld [vmem:[%s3922_s6] sm:$0xff]  ;;  %2071 = vmatprep.mubr.msk.f32.mxu0 %vm58_vm1, %v41_v37  ;;  %v42_v39 = vld [vmem:[%s3916_s0 + $0x18] sm:$0xff]  ;;  %v206_v41 = vld [vmem:[%s3922_s6 + $0x10] sm:$0xff] }
   0xf   :  { %v2712_v38 = vpack.c.bf16 %v205_v36, %v204_v35  ;;  %v43_v40 = vld [vmem:[%s3916_s0 + $0x20] sm:$0xff]  ;;  %v207_v42 = vld [vmem:[%s3922_s6 + $0x18] sm:$0xff]  ;;  %v44_v43 = vld [vmem:[%s3916_s0 + $0x28] sm:$0xff] }
  0x10   :  { %2731 = vmatpush3.bf16.msra.mxu1 %v3318_v20  ;;  %v2716_v44 = vpack.c.bf16 %v207_v42, %v206_v41  ;;  %v45_v45 = vld [vmem:[%s3916_s0 + $0x30] sm:$0xff]  ;;  %v46_v46 = vld [vmem:[%s3916_s0 + $0x38] sm:$0xff]  ;;  %v196_v47 = vld [vmem:[%s3917_s1] sm:$0xff] }
  0x11   :  { %2732 = vmatprep.subr.bf16.mxu1 %v3198_v3  ;;  %2072 = vmatmul.mubr.msk.f32.gmra.mrb[2].mxu0 %vm58_vm1, %v42_v39  ;;  %v197_v48 = vld [vmem:[%s3917_s1 + $0x8] sm:$0xff]  ;;  %v198_v49 = vld [vmem:[%s3917_s1 + $0x10] sm:$0xff]  ;;  %v3456_v52 = vld [vmem:[%s3921_s5] ss:$0 sm:$0xff] }
  0x12   :  { %2713 = vmatprep.subr.bf16.mxu0 %v2712_v38  ;;  %2074 = vmatprep.mubr.msk.f32.mxu0 %vm58_vm1, %v43_v40  ;;  %v199_v58 = vld [vmem:[%s3917_s1 + $0x18] sm:$0xff]  ;;  %v200_v59 = vld [vmem:[%s3917_s1 + $0x20] sm:$0xff]  ;;  %v201_v60 = vld [vmem:[%s3917_s1 + $0x28] sm:$0xff] }
  0x13   :  { %2715 = vmatpush3.bf16.msra.mxu0 %v2712_v38  ;;  %v202_v61 = vld [vmem:[%s3917_s1 + $0x30] sm:$0xff]  ;;  %v203_v62 = vld [vmem:[%s3917_s1 + $0x38] sm:$0xff] }
  0x14   :  { %2734 = vmatpush3.bf16.msra.mxu1 %v3332_v24  ;;  %2717 = vmatprep.subr.bf16.mxu0 %v2716_v44 }
  0x15   :  { %2735 = vmatprep.subr.bf16.mxu1 %v3198_v3  ;;  %2075 = vmatmul.mubr.msk.f32.gmra.mrb[4].mxu0 %vm58_vm1, %v44_v43 }
  0x16   :  { %2077 = vmatprep.mubr.msk.f32.mxu0 %vm58_vm1, %v45_v45 }
  0x17   :  { %2719 = vmatpush3.bf16.msra.mxu0 %v2716_v44  ;;  %v371_v44 = vld [vmem:[%s3923_s7 + $0x18] sm:$0xff] }
  0x18   :  { %2737 = vmatpush3.bf16.msra.mxu1 %v3342_v27  ;;  %2768 = vmatprep.subr.bf16.mxu0 %v3198_v3 }
  0x19   :  { %2738 = vmatprep.subr.bf16.mxu1 %v3198_v3  ;;  %2078 = vmatmul.mubr.msk.f32.gmra.mrb[6].mxu0 %vm58_vm1, %v46_v46  ;;  %v372_v46 = vld [vmem:[%s3923_s7 + $0x20] sm:$0xff] }
  0x1a   :  { %2088 = vmatprep.mubr.msk.f32.mxu0 %vm58_vm1, %v196_v47  ;;  %v373_v47 = vld [vmem:[%s3923_s7 + $0x28] sm:$0xff] }
  0x1c   :  { %2740 = vmatpush3.bf16.msra.mxu1 %v3352_v30 }
  0x1d   :  { %2741 = vmatprep.subr.bf16.mxu1 %v3198_v3  ;;  %2089 = vmatmul.mubr.msk.f32.vlgmr.msra.gmra.mrb[8].mxu0 %vm58_vm1, %v197_v48  ;;  %v3629_v48 = vpack.c.bf16 %v373_v47, %v372_v46  ;;  %v1572_v47 = vld [vmem:[%s3925_s9 + $0x18] sm:$0xff] }
  0x1e   :  { %2770 = vmatpush3.bf16.msra.mxu0 %v3274_v4  ;;  %2091 = vmatprep.mubr.msk.f32.mxu0 %vm58_vm1, %v198_v49  ;;  %v374_v49 = vld [vmem:[%s3923_s7 + $0x30] sm:$0xff] }
  0x1f   :  { %2771 = vmatprep.subr.bf16.mxu0 %v3198_v3 }
  0x20   :  { %2743 = vmatpush3.bf16.msra.mxu1 %v3362_v33 }
  0x21   :  { %2744 = vmatprep.subr.bf16.mxu1 %v3198_v3  ;;  %2092 = vmatmul.mubr.msk.f32.gmra.mrb[10].mxu0 %vm58_vm1, %v199_v58 }
  0x22   :  { %2773 = vmatpush3.bf16.msra.mxu0 %v3282_v7  ;;  %2094 = vmatprep.mubr.msk.f32.mxu0 %vm58_vm1, %v200_v59 }
  0x23   :  { %2133 = vmatmul.mubr.f32.vlgmr.msra.gmra.mrb[0].mxu1 %v384_v34  ;;  %2774 = vmatprep.subr.bf16.mxu0 %v3198_v3 }
  0x24   :  { %2746 = vmatpush3.bf16.msra.mxu1 %v3274_v4  ;;  %2167 = vmatprep.mubr.msk.f32.mxu1 %vm3199_vm0, %v3200_v6 }
  0x25   :  { %2747 = vmatprep.subr.bf16.mxu1 %v3198_v3  ;;  %2095 = vmatmul.mubr.msk.f32.gmra.mrb[12].mxu0 %vm58_vm1, %v201_v60 }
  0x26   :  { %2776 = vmatpush3.bf16.msra.mxu0 %v3307_v17  ;;  %2097 = vmatprep.mubr.msk.f32.mxu0 %vm58_vm1, %v202_v61  ;;  %v378_v61 = vld [vmem:[%s3923_s7 + $0x50] sm:$0xff] }
  0x27   :  { %2777 = vmatprep.subr.bf16.mxu0 %v3198_v3 }
  0x28   :  { %2749 = vmatpush3.bf16.msra.mxu1 %v3282_v7 }
  0x29   :  { %2750 = vmatprep.subr.bf16.mxu1 %v3198_v3  ;;  %2098 = vmatmul.mubr.msk.f32.gmra.mrb[14].mxu0 %vm58_vm1, %v203_v62  ;;  %v379_v62 = vld [vmem:[%s3923_s7 + $0x58] sm:$0xff] }
  0x2a   :  { %2779 = vmatpush3.bf16.msra.mxu0 %v3318_v20  ;;  %2202 = vmatprep.mubr.msk.f32.mxu0 %vm3199_vm0, %v3200_v6 }
  0x2b   :  { %2780 = vmatprep.subr.bf16.mxu0 %v3198_v3 }
  0x2c   :  { %2752 = vmatpush3.bf16.msra.mxu1 %v3307_v17 }
  0x2d   :  { %2753 = vmatprep.subr.bf16.mxu1 %v3198_v3 }
  0x2e   :  { %2782 = vmatpush3.bf16.msra.mxu0 %v3332_v24 }
  0x2f   :  { %2783 = vmatprep.subr.bf16.mxu0 %v3198_v3 }
  0x30   :  { %2755 = vmatpush3.bf16.msra.mxu1 %v3318_v20 }
  0x31   :  { %2756 = vmatprep.subr.bf16.mxu1 %v3198_v3 }
  0x32   :  { %2785 = vmatpush3.bf16.msra.mxu0 %v3342_v27 }
  0x33   :  { %2786 = vmatprep.subr.bf16.mxu0 %v3198_v3 }
  0x34   :  { %2758 = vmatpush3.bf16.msra.mxu1 %v3332_v24 }
  0x35   :  { %2759 = vmatprep.subr.bf16.mxu1 %v3198_v3 }
  0x36   :  { %2788 = vmatpush3.bf16.msra.mxu0 %v3352_v30 }
  0x37   :  { %2789 = vmatprep.subr.bf16.mxu0 %v3198_v3 }
  0x38   :  { %2761 = vmatpush3.bf16.msra.mxu1 %v3342_v27 }
  0x39   :  { %2762 = vmatprep.subr.bf16.mxu1 %v3198_v3 }
  0x3a   :  { %2791 = vmatpush3.bf16.msra.mxu0 %v3362_v33 }
  0x3b   :  { %2816 = vmatprep.subr.bf16.mxu0 %v3198_v3 }
  0x3c   :  { %2764 = vmatpush3.bf16.msra.mxu1 %v3352_v30 }
  0x3d   :  { %2765 = vmatprep.subr.bf16.mxu1 %v3198_v3 }
  0x40   :  { %2767 = vmatpush3.bf16.msra.mxu1 %v3362_v33 }
  0x41   :  { %2792 = vmatprep.subr.bf16.mxu1 %v3198_v3 }
  0xe0   :  { %v2070_v50 = vpop.f32.mrb[0].mxu0 }
  0xe1   :  { %v149_v51 = vpop.f32.mrb[1].mxu0  ;;  %v155_v11 = vadd.f32 %v2070_v50, %v3456_v52  ;;  %v375_v50 = vld [vmem:[%s3923_s7 + $0x38] sm:$0xff] }
  0xe2   :  { %v150_v53 = vadd.f32 %v3456_v52, %v149_v51  ;;  %v3639_v51 = vpack.c.bf16 %v375_v50, %v374_v49  ;;  %v1573_v50 = vld [vmem:[%s3925_s9 + $0x20] sm:$0xff] }
  0xe4   :  { %v2073_v63 = vpop.f32.mrb[2].mxu0 }
  0xe5   :  { %v159_v0 = vpop.f32.mrb[3].mxu0  ;;  %v165_v32 = vadd.f32 %v2073_v63, %v3456_v52  ;;  %v3674_v63 = vpack.c.bf16 %v379_v62, %v378_v61  ;;  %v1581_v62 = vld [vmem:[%s3925_s9 + $0x60] sm:$0xff] }
  0xe6   :  { %v160_v25 = vadd.f32 %v3456_v52, %v159_v0  ;;  %v380_v0 = vld [vmem:[%s3923_s7 + $0x60] sm:$0xff] }
  0xe8   :  { %v3499_v1 = vpop.f32.mrb[4].mxu0 }
  0xe9   :  { %v3501_v2 = vpop.f32.mrb[5].mxu0 }
  0xea   :  { %v170_v38 = vadd.f32 %v3456_v52, %v3501_v2 }
  0xec   :  { %v3503_v5 = vpop.f32.mrb[6].mxu0 }
  0xed   :  { %v3505_v8 = vpop.f32.mrb[7].mxu0 }
  0xf0   :  { %v3507_v9 = vpop.f32.mrb[8].mxu0 }
  0xf1   :  { %v3509_v10 = vpop.f32.mrb[9].mxu0 }
  0xf4   :  { %v3530_v16 = vpop.f32.mrb[10].mxu0 }
  0xf5   :  { %v3532_v18 = vpop.f32.mrb[11].mxu0 }
  0xf6   :  { %v452_v54 = vpop.f32.mrb[0].mxu1 }
  0xf7   :  { %v456_v55 = vadd.f32 %v452_v54, %v150_v53  ;;  %v2134_v56 = vpop.f32.mrb[1].mxu1  ;;  %v376_v53 = vld [vmem:[%s3923_s7 + $0x40] sm:$0xff]  ;;  %v377_v54 = vld [vmem:[%s3923_s7 + $0x48] sm:$0xff] }
  0xf8   :  { %v3534_v19 = vpop.f32.mrb[12].mxu0  ;;  %v180_v56 = vadd.f32 %v3456_v52, %v3505_v8  ;;  %v382_v8 = vld [vmem:[%s3923_s7 + $0x70] sm:$0xff] }
  0xf9   :  { %3142 = vtanh.f32 %v456_v55  ;;  %v3536_v21 = vpop.f32.mrb[13].mxu0  ;;  %v3649_v55 = vpack.c.bf16 %v377_v54, %v376_v53  ;;  %v1575_v53 = vld [vmem:[%s3925_s9 + $0x30] sm:$0xff]  ;;  %v1576_v54 = vld [vmem:[%s3925_s9 + $0x38] sm:$0xff] }
  0xfc   :  { %v3538_v22 = vpop.f32.mrb[14].mxu0 }
  0xfd   :  { %v3540_v23 = vpop.f32.mrb[15].mxu0 }
 0x103   :  { %v3143_v57 = vpop.eup %3142 }
 0x104   :  { %2168 = vmatmul.mubr.f32.vlgmr.msra.gmra.mrb[2].mxu1 %v3143_v57 }
 0x105   :  { %2794 = vmatpush3.bf16.msra.mxu1 %v3274_v4  ;;  %2237 = vmatprep.mubr.msk.f32.mxu1 %vm3199_vm0, %v3200_v6 }
 0x106   :  { %2795 = vmatprep.subr.bf16.mxu1 %v3198_v3 }
 0x109   :  { %2797 = vmatpush3.bf16.msra.mxu1 %v3282_v7 }
 0x10a   :  { %2798 = vmatprep.subr.bf16.mxu1 %v3198_v3 }
 0x10d   :  { %2800 = vmatpush3.bf16.msra.mxu1 %v3307_v17 }
 0x10e   :  { %2801 = vmatprep.subr.bf16.mxu1 %v3198_v3 }
 0x111   :  { %2803 = vmatpush3.bf16.msra.mxu1 %v3318_v20 }
 0x112   :  { %2804 = vmatprep.subr.bf16.mxu1 %v3198_v3 }
 0x115   :  { %2806 = vmatpush3.bf16.msra.mxu1 %v3332_v24 }
 0x116   :  { %2807 = vmatprep.subr.bf16.mxu1 %v3198_v3 }
 0x119   :  { %2809 = vmatpush3.bf16.msra.mxu1 %v3342_v27 }
 0x11a   :  { %2810 = vmatprep.subr.bf16.mxu1 %v3198_v3 }
 0x11d   :  { %2812 = vmatpush3.bf16.msra.mxu1 %v3352_v30 }
 0x11e   :  { %2813 = vmatprep.subr.bf16.mxu1 %v3198_v3 }
 0x121   :  { %2815 = vmatpush3.bf16.msra.mxu1 %v3362_v33 }
 0x122   :  { %2840 = vmatprep.subr.bf16.mxu1 %v3198_v3 }
 0x1d7   :  { %v525_v12 = vpop.f32.mrb[2].mxu1 }
 0x1d8   :  { %v529_v13 = vadd.f32 %v525_v12, %v155_v11  ;;  %v2169_v14 = vpop.f32.mrb[3].mxu1  ;;  %v383_v11 = vld [vmem:[%s3923_s7 + $0x78] sm:$0xff] }
 0x1d9   :  { %v3695_v12 = vpack.c.bf16 %v383_v11, %v382_v8 }
 0x1da   :  { %3144 = vtanh.f32 %v529_v13  ;;  %v185_v13 = vadd.f32 %v3503_v5, %v3456_v52 }
 0x1e4   :  { %v3145_v15 = vpop.eup %3144 }
 0x1e5   :  { %2203 = vmatmul.mubr.f32.vlgmr.msra.gmra.mrb[16].mxu0 %v3145_v15 }
 0x1e6   :  { %2818 = vmatpush3.bf16.msra.mxu0 %v3274_v4  ;;  %2272 = vmatprep.mubr.msk.f32.mxu0 %vm3199_vm0, %v3200_v6 }
 0x1e7   :  { %2819 = vmatprep.subr.bf16.mxu0 %v3198_v3 }
 0x1ea   :  { %2821 = vmatpush3.bf16.msra.mxu0 %v3282_v7 }
 0x1eb   :  { %2822 = vmatprep.subr.bf16.mxu0 %v3198_v3 }
 0x1ee   :  { %2824 = vmatpush3.bf16.msra.mxu0 %v3307_v17 }
 0x1ef   :  { %2825 = vmatprep.subr.bf16.mxu0 %v3198_v3 }
 0x1f2   :  { %2827 = vmatpush3.bf16.msra.mxu0 %v3318_v20 }
 0x1f3   :  { %2828 = vmatprep.subr.bf16.mxu0 %v3198_v3 }
 0x1f6   :  { %2830 = vmatpush3.bf16.msra.mxu0 %v3332_v24 }
 0x1f7   :  { %2831 = vmatprep.subr.bf16.mxu0 %v3198_v3 }
 0x1fa   :  { %2833 = vmatpush3.bf16.msra.mxu0 %v3342_v27 }
 0x1fb   :  { %2834 = vmatprep.subr.bf16.mxu0 %v3198_v3 }
 0x1fe   :  { %2836 = vmatpush3.bf16.msra.mxu0 %v3352_v30 }
 0x1ff   :  { %2837 = vmatprep.subr.bf16.mxu0 %v3198_v3 }
 0x202   :  { %2839 = vmatpush3.bf16.msra.mxu0 %v3362_v33 }
 0x203   :  { %2864 = vmatprep.subr.bf16.mxu0 %v3198_v3 }
 0x2b8   :  { %v598_v26 = vpop.f32.mrb[16].mxu0 }
 0x2b9   :  { %v602_v28 = vadd.f32 %v598_v26, %v160_v25  ;;  %v2204_v29 = vpop.f32.mrb[17].mxu0 }
 0x2bb   :  { %3146 = vtanh.f32 %v602_v28 }
 0x2c5   :  { %v3147_v31 = vpop.eup %3146 }
 0x2c6   :  { %2238 = vmatmul.mubr.f32.vlgmr.msra.gmra.mrb[4].mxu1 %v3147_v31 }
 0x2c7   :  { %2842 = vmatpush3.bf16.msra.mxu1 %v3274_v4  ;;  %2307 = vmatprep.mubr.msk.f32.mxu1 %vm3199_vm0, %v3200_v6 }
 0x2c8   :  { %2843 = vmatprep.subr.bf16.mxu1 %v3198_v3 }
 0x2cb   :  { %2845 = vmatpush3.bf16.msra.mxu1 %v3282_v7 }
 0x2cc   :  { %2846 = vmatprep.subr.bf16.mxu1 %v3198_v3 }
 0x2cf   :  { %2848 = vmatpush3.bf16.msra.mxu1 %v3307_v17 }
 0x2d0   :  { %2849 = vmatprep.subr.bf16.mxu1 %v3198_v3 }
 0x2d3   :  { %2851 = vmatpush3.bf16.msra.mxu1 %v3318_v20 }
 0x2d4   :  { %2852 = vmatprep.subr.bf16.mxu1 %v3198_v3 }
 0x2d7   :  { %2854 = vmatpush3.bf16.msra.mxu1 %v3332_v24 }
 0x2d8   :  { %2855 = vmatprep.subr.bf16.mxu1 %v3198_v3 }
 0x2db   :  { %2857 = vmatpush3.bf16.msra.mxu1 %v3342_v27 }
 0x2dc   :  { %2858 = vmatprep.subr.bf16.mxu1 %v3198_v3 }
 0x2df   :  { %2860 = vmatpush3.bf16.msra.mxu1 %v3352_v30 }
 0x2e0   :  { %2861 = vmatprep.subr.bf16.mxu1 %v3198_v3 }
 0x2e3   :  { %2863 = vmatpush3.bf16.msra.mxu1 %v3362_v33 }
 0x2e4   :  { %2888 = vmatprep.subr.bf16.mxu1 %v3198_v3 }
 0x399   :  { %v671_v34 = vpop.f32.mrb[4].mxu1 }
 0x39a   :  { %v675_v35 = vadd.f32 %v671_v34, %v165_v32  ;;  %v2239_v36 = vpop.f32.mrb[5].mxu1 }
 0x39c   :  { %3148 = vtanh.f32 %v675_v35 }
 0x3a6   :  { %v3149_v37 = vpop.eup %3148 }
 0x3a7   :  { %2273 = vmatmul.mubr.f32.vlgmr.msra.gmra.mrb[18].mxu0 %v3149_v37 }
 0x3a8   :  { %2866 = vmatpush3.bf16.msra.mxu0 %v3274_v4  ;;  %2342 = vmatprep.mubr.msk.f32.mxu0 %vm3199_vm0, %v3200_v6 }
 0x3a9   :  { %2867 = vmatprep.subr.bf16.mxu0 %v3198_v3 }
 0x3ac   :  { %2869 = vmatpush3.bf16.msra.mxu0 %v3282_v7 }
 0x3ad   :  { %2870 = vmatprep.subr.bf16.mxu0 %v3198_v3 }
 0x3b0   :  { %2872 = vmatpush3.bf16.msra.mxu0 %v3307_v17 }
 0x3b1   :  { %2873 = vmatprep.subr.bf16.mxu0 %v3198_v3 }
 0x3b4   :  { %2875 = vmatpush3.bf16.msra.mxu0 %v3318_v20 }
 0x3b5   :  { %2876 = vmatprep.subr.bf16.mxu0 %v3198_v3 }
 0x3b8   :  { %2878 = vmatpush3.bf16.msra.mxu0 %v3332_v24 }
 0x3b9   :  { %2879 = vmatprep.subr.bf16.mxu0 %v3198_v3 }
 0x3bc   :  { %2881 = vmatpush3.bf16.msra.mxu0 %v3342_v27 }
 0x3bd   :  { %2882 = vmatprep.subr.bf16.mxu0 %v3198_v3 }
 0x3c0   :  { %2884 = vmatpush3.bf16.msra.mxu0 %v3352_v30 }
 0x3c1   :  { %2885 = vmatprep.subr.bf16.mxu0 %v3198_v3 }
 0x3c4   :  { %2887 = vmatpush3.bf16.msra.mxu0 %v3362_v33 }
 0x3c5   :  { %2912 = vmatprep.subr.bf16.mxu0 %v3198_v3 }
 0x47a   :  { %v744_v39 = vpop.f32.mrb[18].mxu0 }
 0x47b   :  { %v748_v40 = vadd.f32 %v744_v39, %v170_v38  ;;  %v2274_v41 = vpop.f32.mrb[19].mxu0 }
 0x47d   :  { %3150 = vtanh.f32 %v748_v40 }
 0x487   :  { %v3151_v42 = vpop.eup %3150 }
 0x488   :  { %2308 = vmatmul.mubr.f32.vlgmr.msra.gmra.mrb[6].mxu1 %v3151_v42 }
 0x489   :  { %2890 = vmatpush3.bf16.msra.mxu1 %v3274_v4  ;;  %2377 = vmatprep.mubr.msk.f32.mxu1 %vm3199_vm0, %v3200_v6  ;;  %v175_v4 = vadd.f32 %v3499_v1, %v3456_v52  ;;  %v381_v1 = vld [vmem:[%s3923_s7 + $0x68] sm:$0xff]  ;;  %v3727_v52 = vld [vmem:[%s3924_s8] ss:$0 sm:$0xff] }
 0x48a   :  { %2891 = vmatprep.subr.bf16.mxu1 %v3198_v3  ;;  %v3685_v2 = vpack.c.bf16 %v381_v1, %v380_v0  ;;  %v306_v5 = vadd.f32 %v3727_v52, %v3509_v10  ;;  %v311_v10 = vadd.f32 %v3507_v9, %v3727_v52  ;;  %v316_v9 = vadd.f32 %v3727_v52, %v3532_v18  ;;  %v1583_v1 = vld [vmem:[%s3925_s9 + $0x70] sm:$0xff] }
 0x48b   :  { %v321_v18 = vadd.f32 %v3530_v16, %v3727_v52  ;;  %v326_v16 = vadd.f32 %v3727_v52, %v3536_v21  ;;  %v1570_v21 = vld [vmem:[%s3925_s9 + $0x8] sm:$0xff]  ;;  %v336_v11 = vadd.f32 %v3727_v52, %v3540_v23 }
 0x48d   :  { %2893 = vmatpush3.bf16.msra.mxu1 %v3282_v7 }
 0x48e   :  { %2894 = vmatprep.subr.bf16.mxu1 %v3198_v3 }
 0x491   :  { %2896 = vmatpush3.bf16.msra.mxu1 %v3307_v17 }
 0x492   :  { %2897 = vmatprep.subr.bf16.mxu1 %v3198_v3 }
 0x495   :  { %2899 = vmatpush3.bf16.msra.mxu1 %v3318_v20 }
 0x496   :  { %2900 = vmatprep.subr.bf16.mxu1 %v3198_v3 }
 0x499   :  { %2902 = vmatpush3.bf16.msra.mxu1 %v3332_v24 }
 0x49a   :  { %2903 = vmatprep.subr.bf16.mxu1 %v3198_v3 }
 0x49d   :  { %2905 = vmatpush3.bf16.msra.mxu1 %v3342_v27  ;;  %v368_v27 = vld [vmem:[%s3923_s7] sm:$0xff] }
 0x49e   :  { %2906 = vmatprep.subr.bf16.mxu1 %v3198_v3 }
 0x4a1   :  { %2908 = vmatpush3.bf16.msra.mxu1 %v3352_v30  ;;  %v369_v30 = vld [vmem:[%s3923_s7 + $0x8] sm:$0xff] }
 0x4a2   :  { %2909 = vmatprep.subr.bf16.mxu1 %v3198_v3  ;;  %v3613_v43 = vpack.c.bf16 %v369_v30, %v368_v27 }
 0x4a5   :  { %2911 = vmatpush3.bf16.msra.mxu1 %v3362_v33  ;;  %v370_v33 = vld [vmem:[%s3923_s7 + $0x10] sm:$0xff] }
 0x4a6   :  { %2936 = vmatprep.subr.bf16.mxu1 %v3198_v3  ;;  %v3619_v45 = vpack.c.bf16 %v371_v44, %v370_v33 }
 0x55b   :  { %v817_v7 = vpop.f32.mrb[6].mxu1 }
 0x55c   :  { %v821_v17 = vadd.f32 %v817_v7, %v175_v4  ;;  %v2309_v20 = vpop.f32.mrb[7].mxu1 }
 0x55e   :  { %3152 = vtanh.f32 %v821_v17 }
 0x568   :  { %v3153_v24 = vpop.eup %3152 }
 0x569   :  { %2343 = vmatmul.mubr.f32.vlgmr.msra.gmra.mrb[20].mxu0 %v3153_v24 }
 0x56a   :  { %2412 = vmatprep.mubr.msk.f32.mxu0 %vm3199_vm0, %v3200_v6  ;;  %2914 = vmatpush3.bf16.msra.mxu0 %v3613_v43 }
 0x56b   :  { %2915 = vmatprep.subr.bf16.mxu0 %v3198_v3 }
 0x56e   :  { %2917 = vmatpush3.bf16.msra.mxu0 %v3619_v45 }
 0x56f   :  { %2918 = vmatprep.subr.bf16.mxu0 %v3198_v3 }
 0x572   :  { %2920 = vmatpush3.bf16.msra.mxu0 %v3629_v48 }
 0x573   :  { %2921 = vmatprep.subr.bf16.mxu0 %v3198_v3 }
 0x576   :  { %2923 = vmatpush3.bf16.msra.mxu0 %v3639_v51 }
 0x577   :  { %2924 = vmatprep.subr.bf16.mxu0 %v3198_v3 }
 0x57a   :  { %2926 = vmatpush3.bf16.msra.mxu0 %v3649_v55 }
 0x57b   :  { %2927 = vmatprep.subr.bf16.mxu0 %v3198_v3 }
 0x57e   :  { %2929 = vmatpush3.bf16.msra.mxu0 %v3674_v63 }
 0x57f   :  { %2930 = vmatprep.subr.bf16.mxu0 %v3198_v3 }
 0x582   :  { %2932 = vmatpush3.bf16.msra.mxu0 %v3685_v2 }
 0x583   :  { %2933 = vmatprep.subr.bf16.mxu0 %v3198_v3 }
 0x586   :  { %2935 = vmatpush3.bf16.msra.mxu0 %v3695_v12 }
 0x587   :  { %2960 = vmatprep.subr.bf16.mxu0 %v3198_v3 }
 0x63c   :  { %v890_v57 = vpop.f32.mrb[20].mxu0 }
 0x63d   :  { %v894_v58 = vadd.f32 %v890_v57, %v180_v56  ;;  %v2344_v59 = vpop.f32.mrb[21].mxu0  ;;  %v1577_v56 = vld [vmem:[%s3925_s9 + $0x40] sm:$0xff]  ;;  %v1578_v57 = vld [vmem:[%s3925_s9 + $0x48] sm:$0xff] }
 0x63e   :  { %v1579_v59 = vld [vmem:[%s3925_s9 + $0x50] sm:$0xff] }
 0x63f   :  { %3154 = vtanh.f32 %v894_v58  ;;  %v3120_v58 = vpack.c.bf16 %v1578_v57, %v1577_v56 }
 0x649   :  { %v3155_v60 = vpop.eup %3154 }
 0x64a   :  { %2378 = vmatmul.mubr.f32.vlgmr.msra.gmra.mrb[8].mxu1 %v3155_v60  ;;  %v1580_v60 = vld [vmem:[%s3925_s9 + $0x58] sm:$0xff] }
 0x64b   :  { %2938 = vmatpush3.bf16.msra.mxu1 %v3613_v43  ;;  %2447 = vmatprep.mubr.msk.f32.mxu1 %vm3199_vm0, %v3200_v6  ;;  %v3124_v61 = vpack.c.bf16 %v1580_v60, %v1579_v59 }
 0x64c   :  { %2939 = vmatprep.subr.bf16.mxu1 %v3198_v3 }
 0x64f   :  { %2941 = vmatpush3.bf16.msra.mxu1 %v3619_v45 }
 0x650   :  { %2942 = vmatprep.subr.bf16.mxu1 %v3198_v3 }
 0x653   :  { %2944 = vmatpush3.bf16.msra.mxu1 %v3629_v48 }
 0x654   :  { %2945 = vmatprep.subr.bf16.mxu1 %v3198_v3 }
 0x657   :  { %2947 = vmatpush3.bf16.msra.mxu1 %v3639_v51 }
 0x658   :  { %2948 = vmatprep.subr.bf16.mxu1 %v3198_v3 }
 0x65b   :  { %2950 = vmatpush3.bf16.msra.mxu1 %v3649_v55 }
 0x65c   :  { %2951 = vmatprep.subr.bf16.mxu1 %v3198_v3 }
 0x65f   :  { %2953 = vmatpush3.bf16.msra.mxu1 %v3674_v63 }
 0x660   :  { %2954 = vmatprep.subr.bf16.mxu1 %v3198_v3 }
 0x663   :  { %2956 = vmatpush3.bf16.msra.mxu1 %v3685_v2 }
 0x664   :  { %2957 = vmatprep.subr.bf16.mxu1 %v3198_v3 }
 0x667   :  { %2959 = vmatpush3.bf16.msra.mxu1 %v3695_v12 }
 0x668   :  { %2984 = vmatprep.subr.bf16.mxu1 %v3198_v3 }
 0x71d   :  { %v963_v14 = vpop.f32.mrb[8].mxu1 }
 0x71e   :  { %v967_v15 = vadd.f32 %v963_v14, %v185_v13  ;;  %v2379_v25 = vpop.f32.mrb[9].mxu1 }
 0x71f   :  { %v1739_v25 = vld [vmem:[%s3926_s10] ss:$0 sm:$0xff]  ;;  %s3201_s10 = smov [#allocation5]  }
 0x720   :  { %3156 = vtanh.f32 %v967_v15  ;;  %s1710_s2 = sshll.u32 %s3201_s10, 4  ;;  %s1711_s2 = int_to_ptr.vmem [resolvable:$true] %s1710_s2 }
 0x721   :  { %s3174_s4 = scalar_lea.vmem %s1711_s2, 1024  ;;  %p3179_p1 = scmp.lt.s32.totalorder %s1711_s2, %s1711_s2 }
 0x722   :  { %p3175_p0 = scmp.ne.s32.totalorder %s1711_s2, %s3174_s4  ;;  %p3180_p2 = scmp.lt.s32.totalorder %s3174_s4, %s3174_s4 }
 0x724   :  { %p3181_p3 = por %p3180_p2, %p3179_p1 }
 0x726   :  { %p3182_p4 = pnand %p3181_p3, %p3175_p0 }
 0x72a   :  { %v3157_v26 = vpop.eup %3156 }
 0x72b   :  { %2413 = vmatmul.mubr.f32.vlgmr.msra.gmra.mrb[22].mxu0 %v3157_v26 }
 0x72c   :  { %2962 = vmatpush3.bf16.msra.mxu0 %v3613_v43  ;;  %2482 = vmatprep.mubr.msk.f32.mxu0 %vm3199_vm0, %v3200_v6 }
 0x72d   :  { %2963 = vmatprep.subr.bf16.mxu0 %v3198_v3 }
 0x730   :  { %2965 = vmatpush3.bf16.msra.mxu0 %v3619_v45 }
 0x731   :  { %2966 = vmatprep.subr.bf16.mxu0 %v3198_v3 }
 0x734   :  { %2968 = vmatpush3.bf16.msra.mxu0 %v3629_v48 }
 0x735   :  { %2969 = vmatprep.subr.bf16.mxu0 %v3198_v3 }
 0x738   :  { %2971 = vmatpush3.bf16.msra.mxu0 %v3639_v51 }
 0x739   :  { %2972 = vmatprep.subr.bf16.mxu0 %v3198_v3 }
 0x73c   :  { %2974 = vmatpush3.bf16.msra.mxu0 %v3649_v55 }
 0x73d   :  { %2975 = vmatprep.subr.bf16.mxu0 %v3198_v3 }
 0x740   :  { %2977 = vmatpush3.bf16.msra.mxu0 %v3674_v63 }
 0x741   :  { %2978 = vmatprep.subr.bf16.mxu0 %v3198_v3 }
 0x744   :  { %2980 = vmatpush3.bf16.msra.mxu0 %v3685_v2 }
 0x745   :  { %2981 = vmatprep.subr.bf16.mxu0 %v3198_v3 }
 0x748   :  { %2983 = vmatpush3.bf16.msra.mxu0 %v3695_v12 }
 0x749   :  { %3008 = vmatprep.subr.bf16.mxu0 %v3198_v3 }
 0x7fe   :  { %v1036_v28 = vpop.f32.mrb[22].mxu0 }
 0x7ff   :  { %v1040_v29 = vadd.f32 %v1036_v28, %v306_v5  ;;  %v2414_v31 = vpop.f32.mrb[23].mxu0 }
 0x801   :  { %3158 = vtanh.f32 %v1040_v29 }
 0x80b   :  { %v3731_v32 = vpop.eup %3158 }
 0x80c   :  { %2448 = vmatmul.mubr.f32.vlgmr.msra.gmra.mrb[10].mxu1 %v3731_v32 }
 0x80d   :  { %2986 = vmatpush3.bf16.msra.mxu1 %v3613_v43  ;;  %2517 = vmatprep.mubr.msk.f32.mxu1 %vm3199_vm0, %v3200_v6 }
 0x80e   :  { %2987 = vmatprep.subr.bf16.mxu1 %v3198_v3 }
 0x811   :  { %2989 = vmatpush3.bf16.msra.mxu1 %v3619_v45 }
 0x812   :  { %2990 = vmatprep.subr.bf16.mxu1 %v3198_v3 }
 0x815   :  { %2992 = vmatpush3.bf16.msra.mxu1 %v3629_v48 }
 0x816   :  { %2993 = vmatprep.subr.bf16.mxu1 %v3198_v3 }
 0x819   :  { %2995 = vmatpush3.bf16.msra.mxu1 %v3639_v51 }
 0x81a   :  { %2996 = vmatprep.subr.bf16.mxu1 %v3198_v3 }
 0x81d   :  { %2998 = vmatpush3.bf16.msra.mxu1 %v3649_v55 }
 0x81e   :  { %2999 = vmatprep.subr.bf16.mxu1 %v3198_v3 }
 0x821   :  { %3001 = vmatpush3.bf16.msra.mxu1 %v3674_v63 }
 0x822   :  { %3002 = vmatprep.subr.bf16.mxu1 %v3198_v3 }
 0x825   :  { %3004 = vmatpush3.bf16.msra.mxu1 %v3685_v2 }
 0x826   :  { %3005 = vmatprep.subr.bf16.mxu1 %v3198_v3 }
 0x829   :  { %3007 = vmatpush3.bf16.msra.mxu1 %v3695_v12 }
 0x82a   :  { %3032 = vmatprep.subr.bf16.mxu1 %v3198_v3 }
 0x8df   :  { %v1110_v34 = vpop.f32.mrb[10].mxu1 }
 0x8e0   :  { %v1114_v35 = vadd.f32 %v1110_v34, %v311_v10  ;;  %v2449_v36 = vpop.f32.mrb[11].mxu1 }
 0x8e2   :  { %3160 = vtanh.f32 %v1114_v35 }
 0x8ec   :  { %v3754_v37 = vpop.eup %3160 }
 0x8ed   :  { %2483 = vmatmul.mubr.f32.vlgmr.msra.gmra.mrb[24].mxu0 %v3754_v37 }
 0x8ee   :  { %3010 = vmatpush3.bf16.msra.mxu0 %v3613_v43  ;;  %2552 = vmatprep.mubr.msk.f32.mxu0 %vm3199_vm0, %v3200_v6 }
 0x8ef   :  { %3011 = vmatprep.subr.bf16.mxu0 %v3198_v3 }
 0x8f2   :  { %3013 = vmatpush3.bf16.msra.mxu0 %v3619_v45 }
 0x8f3   :  { %3014 = vmatprep.subr.bf16.mxu0 %v3198_v3 }
 0x8f6   :  { %3016 = vmatpush3.bf16.msra.mxu0 %v3629_v48 }
 0x8f7   :  { %3017 = vmatprep.subr.bf16.mxu0 %v3198_v3 }
 0x8fa   :  { %3019 = vmatpush3.bf16.msra.mxu0 %v3639_v51 }
 0x8fb   :  { %3020 = vmatprep.subr.bf16.mxu0 %v3198_v3 }
 0x8fe   :  { %3022 = vmatpush3.bf16.msra.mxu0 %v3649_v55 }
 0x8ff   :  { %3023 = vmatprep.subr.bf16.mxu0 %v3198_v3 }
 0x902   :  { %3025 = vmatpush3.bf16.msra.mxu0 %v3674_v63 }
 0x903   :  { %3026 = vmatprep.subr.bf16.mxu0 %v3198_v3 }
 0x906   :  { %3028 = vmatpush3.bf16.msra.mxu0 %v3685_v2 }
 0x907   :  { %3029 = vmatprep.subr.bf16.mxu0 %v3198_v3 }
 0x90a   :  { %3031 = vmatpush3.bf16.msra.mxu0 %v3695_v12 }
 0x90b   :  { %3056 = vmatprep.subr.bf16.mxu0 %v3198_v3 }
 0x9c0   :  { %v1184_v38 = vpop.f32.mrb[24].mxu0 }
 0x9c1   :  { %v1188_v39 = vadd.f32 %v1184_v38, %v316_v9  ;;  %v2484_v40 = vpop.f32.mrb[25].mxu0  ;;  %v341_v9 = vadd.f32 %v3538_v22, %v3727_v52 }
 0x9c3   :  { %3162 = vtanh.f32 %v1188_v39 }
 0x9cd   :  { %v3777_v41 = vpop.eup %3162 }
 0x9ce   :  { %2518 = vmatmul.mubr.f32.vlgmr.msra.gmra.mrb[12].mxu1 %v3777_v41 }
 0x9cf   :  { %3034 = vmatpush3.bf16.msra.mxu1 %v3613_v43  ;;  %2587 = vmatprep.mubr.msk.f32.mxu1 %vm3199_vm0, %v3200_v6 }
 0x9d0   :  { %3035 = vmatprep.subr.bf16.mxu1 %v3198_v3 }
 0x9d3   :  { %3037 = vmatpush3.bf16.msra.mxu1 %v3619_v45 }
 0x9d4   :  { %3038 = vmatprep.subr.bf16.mxu1 %v3198_v3 }
 0x9d7   :  { %3040 = vmatpush3.bf16.msra.mxu1 %v3629_v48 }
 0x9d8   :  { %3041 = vmatprep.subr.bf16.mxu1 %v3198_v3 }
 0x9db   :  { %3043 = vmatpush3.bf16.msra.mxu1 %v3639_v51 }
 0x9dc   :  { %3044 = vmatprep.subr.bf16.mxu1 %v3198_v3 }
 0x9df   :  { %3046 = vmatpush3.bf16.msra.mxu1 %v3649_v55 }
 0x9e0   :  { %3047 = vmatprep.subr.bf16.mxu1 %v3198_v3 }
 0x9e3   :  { %3049 = vmatpush3.bf16.msra.mxu1 %v3674_v63 }
 0x9e4   :  { %3050 = vmatprep.subr.bf16.mxu1 %v3198_v3 }
 0x9e7   :  { %3052 = vmatpush3.bf16.msra.mxu1 %v3685_v2 }
 0x9e8   :  { %3053 = vmatprep.subr.bf16.mxu1 %v3198_v3 }
 0x9eb   :  { %3055 = vmatpush3.bf16.msra.mxu1 %v3695_v12 }
 0x9ec   :  { %3080 = vmatprep.subr.bf16.mxu1 %v3198_v3 }
 0xaa1   :  { %v1258_v42 = vpop.f32.mrb[12].mxu1 }
 0xaa2   :  { %v1262_v4 = vadd.f32 %v1258_v42, %v321_v18  ;;  %v2519_v7 = vpop.f32.mrb[13].mxu1 }
 0xaa4   :  { %3164 = vtanh.f32 %v1262_v4 }
 0xaae   :  { %v3800_v17 = vpop.eup %3164 }
 0xaaf   :  { %2553 = vmatmul.mubr.f32.vlgmr.msra.gmra.mrb[26].mxu0 %v3800_v17 }
 0xab0   :  { %3058 = vmatpush3.bf16.msra.mxu0 %v3613_v43  ;;  %2622 = vmatprep.mubr.msk.f32.mxu0 %vm3199_vm0, %v3200_v6 }
 0xab1   :  { %3059 = vmatprep.subr.bf16.mxu0 %v3198_v3 }
 0xab4   :  { %3061 = vmatpush3.bf16.msra.mxu0 %v3619_v45 }
 0xab5   :  { %3062 = vmatprep.subr.bf16.mxu0 %v3198_v3 }
 0xab8   :  { %3064 = vmatpush3.bf16.msra.mxu0 %v3629_v48 }
 0xab9   :  { %3065 = vmatprep.subr.bf16.mxu0 %v3198_v3 }
 0xabc   :  { %3067 = vmatpush3.bf16.msra.mxu0 %v3639_v51 }
 0xabd   :  { %3068 = vmatprep.subr.bf16.mxu0 %v3198_v3 }
 0xac0   :  { %3070 = vmatpush3.bf16.msra.mxu0 %v3649_v55 }
 0xac1   :  { %3071 = vmatprep.subr.bf16.mxu0 %v3198_v3 }
 0xac4   :  { %3073 = vmatpush3.bf16.msra.mxu0 %v3674_v63 }
 0xac5   :  { %3074 = vmatprep.subr.bf16.mxu0 %v3198_v3 }
 0xac8   :  { %3076 = vmatpush3.bf16.msra.mxu0 %v3685_v2 }
 0xac9   :  { %3077 = vmatprep.subr.bf16.mxu0 %v3198_v3 }
 0xacc   :  { %3079 = vmatpush3.bf16.msra.mxu0 %v3695_v12 }
 0xb82   :  { %v1332_v20 = vpop.f32.mrb[26].mxu0 }
 0xb83   :  { %v1336_v24 = vadd.f32 %v1332_v20, %v326_v16  ;;  %v2554_v27 = vpop.f32.mrb[27].mxu0 }
 0xb85   :  { %3166 = vtanh.f32 %v1336_v24 }
 0xb8f   :  { %v3822_v30 = vpop.eup %3166 }
 0xb90   :  { %2588 = vmatmul.mubr.f32.vlgmr.msra.gmra.mrb[14].mxu1 %v3822_v30 }
 0xb91   :  { %3082 = vmatpush3.bf16.msra.mxu1 %v3613_v43  ;;  %2657 = vmatprep.mubr.msk.f32.mxu1 %vm3199_vm0, %v3200_v6  ;;  %v1569_v6 = vld [vmem:[%s3925_s9] sm:$0xff]  ;;  %v331_v43 = vadd.f32 %v3534_v19, %v3727_v52  ;;  %v1574_v19 = vld [vmem:[%s3925_s9 + $0x28] sm:$0xff] }
 0xb92   :  { %3083 = vmatprep.subr.bf16.mxu1 %v3198_v3  ;;  %v3104_v33 = vpack.c.bf16 %v1570_v21, %v1569_v6 }
 0xb94   :  { %3105 = vmatprep.subr.bf16.mxu0 %v3104_v33 }
 0xb95   :  { %3085 = vmatpush3.bf16.msra.mxu1 %v3619_v45 }
 0xb96   :  { %3086 = vmatprep.subr.bf16.mxu1 %v3198_v3 }
 0xb99   :  { %3088 = vmatpush3.bf16.msra.mxu1 %v3629_v48 }
 0xb9a   :  { %3089 = vmatprep.subr.bf16.mxu1 %v3198_v3 }
 0xb9d   :  { %3091 = vmatpush3.bf16.msra.mxu1 %v3639_v51  ;;  %v3112_v51 = vpack.c.bf16 %v1574_v19, %v1573_v50 }
 0xb9e   :  { %3092 = vmatprep.subr.bf16.mxu1 %v3198_v3 }
 0xba1   :  { %3094 = vmatpush3.bf16.msra.mxu1 %v3649_v55  ;;  %v3116_v55 = vpack.c.bf16 %v1576_v54, %v1575_v53 }
 0xba2   :  { %3095 = vmatprep.subr.bf16.mxu1 %v3198_v3 }
 0xba5   :  { %3097 = vmatpush3.bf16.msra.mxu1 %v3674_v63  ;;  %v1582_v63 = vld [vmem:[%s3925_s9 + $0x68] sm:$0xff] }
 0xba6   :  { %3098 = vmatprep.subr.bf16.mxu1 %v3198_v3  ;;  %v3128_v0 = vpack.c.bf16 %v1582_v63, %v1581_v62 }
 0xba9   :  { %3100 = vmatpush3.bf16.msra.mxu1 %v3685_v2  ;;  %v1584_v2 = vld [vmem:[%s3925_s9 + $0x78] sm:$0xff] }
 0xbaa   :  { %3101 = vmatprep.subr.bf16.mxu1 %v3198_v3  ;;  %v1571_v3 = vld [vmem:[%s3925_s9 + $0x10] sm:$0xff]  ;;  %v3132_v8 = vpack.c.bf16 %v1584_v2, %v1583_v1 }
 0xbab   :  { %v3108_v48 = vpack.c.bf16 %v1572_v47, %v1571_v3 }
 0xbad   :  { %3103 = vmatpush3.bf16.msra.mxu1 %v3695_v12 }
 0xc63   :  { %v1406_v44 = vpop.f32.mrb[14].mxu1 }
 0xc64   :  { %v1410_v45 = vadd.f32 %v1406_v44, %v331_v43  ;;  %v2589_v46 = vpop.f32.mrb[15].mxu1 }
 0xc66   :  { %3168 = vtanh.f32 %v1410_v45 }
 0xc70   :  { %v3169_v49 = vpop.eup %3168 }
 0xc71   :  { %2623 = vmatmul.mubr.f32.vlgmr.msra.gmra.mrb[28].mxu0 %v3169_v49 }
 0xc72   :  { %3107 = vmatpush3.bf16.msra.mxu0 %v3104_v33  ;;  %2692 = vmatprep.mubr.f32.mxu0 %v3731_v32 }
 0xc73   :  { %3109 = vmatprep.subr.bf16.mxu0 %v3108_v48 }
 0xc76   :  { %3111 = vmatpush3.bf16.msra.mxu0 %v3108_v48 }
 0xc77   :  { %3113 = vmatprep.subr.bf16.mxu0 %v3112_v51 }
 0xc7a   :  { %3115 = vmatpush3.bf16.msra.mxu0 %v3112_v51 }
 0xc7b   :  { %3117 = vmatprep.subr.bf16.mxu0 %v3116_v55 }
 0xc7e   :  { %3119 = vmatpush3.bf16.msra.mxu0 %v3116_v55 }
 0xc7f   :  { %3121 = vmatprep.subr.bf16.mxu0 %v3120_v58 }
 0xc82   :  { %3123 = vmatpush3.bf16.msra.mxu0 %v3120_v58 }
 0xc83   :  { %3125 = vmatprep.subr.bf16.mxu0 %v3124_v61 }
 0xc86   :  { %3127 = vmatpush3.bf16.msra.mxu0 %v3124_v61 }
 0xc87   :  { %3129 = vmatprep.subr.bf16.mxu0 %v3128_v0 }
 0xc8a   :  { %3131 = vmatpush3.bf16.msra.mxu0 %v3128_v0 }
 0xc8b   :  { %3133 = vmatprep.subr.bf16.mxu0 %v3132_v8 }
 0xc8e   :  { %3135 = vmatpush3.bf16.msra.mxu0 %v3132_v8 }
 0xc91   :  { %2693 = vmatmul.mubr.f32.vlgmr.msra.gmra.mrb[30].mxu0 %v3754_v37 }
 0xc92   :  { %2695 = vmatprep.mubr.f32.mxu0 %v3777_v41 }
 0xc95   :  { %2696 = vmatmul.mubr.f32.gmra.mrb[32].mxu0 %v3800_v17 }
 0xc96   :  { %2698 = vmatprep.mubr.f32.mxu0 %v3822_v30 }
 0xc99   :  { %2699 = vmatmul.mubr.f32.gmra.mrb[34].mxu0 %v3169_v49 }
 0xd44   :  { %v1480_v12 = vpop.f32.mrb[28].mxu0 }
 0xd45   :  { %v1484_v13 = vadd.f32 %v1480_v12, %v336_v11  ;;  %v2624_v14 = vpop.f32.mrb[29].mxu0 }
 0xd47   :  { %3170 = vtanh.f32 %v1484_v13 }
 0xd51   :  { %v3171_v15 = vpop.eup %3170 }
 0xd52   :  { %2658 = vmatmul.mubr.f32.vlgmr.msra.gmra.mrb[16].mxu1 %v3171_v15  ;;  %2701 = vmatprep.mubr.f32.mxu0 %v3171_v15 }
 0xd64   :  { %v2694_v26 = vpop.f32.mrb[30].mxu0 }
 0xd65   :  { %v1664_v5 = vadd.f32 %v2694_v26, %v1739_v25  ;;  %v1658_v28 = vpop.f32.mrb[31].mxu0 }
 0xd66   :  { %v1659_v29 = vadd.f32 %v1739_v25, %v1658_v28 }
 0xd67   :  { %1698 = vst [vmem:[#allocation5 + $0x8] sm:$0xff] %v1664_v5 }
 0xd68   :  { %1697 = vst [vmem:[#allocation5] sm:$0xff] %v1659_v29  ;;  %v2697_v31 = vpop.f32.mrb[32].mxu0 }
 0xd69   :  { %v1674_v32 = vadd.f32 %v2697_v31, %v1739_v25  ;;  %v1668_v23 = vpop.f32.mrb[33].mxu0 }
 0xd6a   :  { %v1669_v10 = vadd.f32 %v1739_v25, %v1668_v23 }
 0xd6b   :  { %1700 = vst [vmem:[#allocation5 + $0x18] sm:$0xff] %v1674_v32 }
 0xd6c   :  { %1699 = vst [vmem:[#allocation5 + $0x10] sm:$0xff] %v1669_v10  ;;  %v2700_v34 = vpop.f32.mrb[34].mxu0 }
 0xd6d   :  { %v1684_v35 = vadd.f32 %v2700_v34, %v1739_v25  ;;  %v1678_v36 = vpop.f32.mrb[35].mxu0 }
 0xd6e   :  { %v1679_v37 = vadd.f32 %v1739_v25, %v1678_v36 }
 0xd6f   :  { %1702 = vst [vmem:[#allocation5 + $0x28] sm:$0xff] %v1684_v35 }
 0xd70   :  { %1701 = vst [vmem:[#allocation5 + $0x20] sm:$0xff] %v1679_v37 }
 0xe25   :  { %v1554_v38 = vpop.f32.mrb[16].mxu1 }
 0xe26   :  { %v1558_v39 = vadd.f32 %v1554_v38, %v341_v9  ;;  %v2659_v40 = vpop.f32.mrb[17].mxu1 }
 0xe28   :  { %3172 = vtanh.f32 %v1558_v39 }
 0xe32   :  { %v3173_v41 = vpop.eup %3172 }
 0xe33   :  { %2702 = vmatmul.mubr.f32.gmra.mrb[36].mxu0 %v3173_v41 }
 0xf06   :  { %v2703_v18 = vpop.f32.mrb[36].mxu0 }
 0xf07   :  { %v1694_v42 = vadd.f32 %v2703_v18, %v1739_v25  ;;  %v1688_v4 = vpop.f32.mrb[37].mxu0 }
 0xf08   :  { %v1689_v7 = vadd.f32 %v1739_v25, %v1688_v4 }
 0xf09   :  { %1704 = vst [vmem:[#allocation5 + $0x38] sm:$0xff] %v1694_v42 }
 0xf0a   :  { %1703 = vst [vmem:[#allocation5 + $0x30] sm:$0xff] %v1689_v7 }
 0xf0b   :  { %3185 = shalt.err (!%p3182_p4)
}
 0xf0c   :  { %s3186_s24 = scalar_lea.hbm %s3927_s11, 1024 }
 0xf0d   :  { %p3187_p5 = scmp.ne.s32.totalorder %s3927_s11, %s3186_s24  ;;  %p3190_p6 = scmp.lt.u32.totalorder %s3186_s24, %s3927_s11 }
 0xf0f   :  { %p3192_p7 = pnand %p3190_p6, %p3187_p5 }
 0xf11   :  { %3195 = shalt.err (!%p3192_p7)
}
 0xf12   :  { %s3202_s28 = smov 128   ;;  %s3203_s29 = smov 8  }
 0xf13   :  { %1716 = dma.vmem_to_hbm [thread:$0]  %s1711_s2, 1024, %s3927_s11, [#allocation6], %s3202_s28, %s3202_s28, %s3203_s29  }
 0xf14   :  { %3196 = dma.done.wait [#allocation6], 1024  }
 0xf15   :  { %3197 = vsyncadd [#allocation6], 4294966272 }
 0xf16   :  { %1720 = vsyncpa [#allocation6], 1 }

</bundles_post_ra>
